<compile_context>
chip_gen: v6e
topology: v6e:2x2x1
jax: 0.10.0
libtpu: 0.0.40
codegen_flags: <defaults>
</compile_context>

<pallas_src>
import functools

import jax
import jax.numpy as jnp
from jax import lax
from jax.experimental import pallas as pl
from jax.experimental.pallas import tpu as pltpu
import numpy as np


def _round_up(n, m):
    return ((n + m - 1) // m) * m


def _gru_kernel(x_ref, wih_hbm, whh_hbm, bi_ref, bhn_ref, out_ref,
                gi_scr, h_scr, wih_scr, whh_scr, sem,
                *, seq_len, chunk_len, batch, hidden, unroll, row_align):
    """One sequence chunk per grid step.

    x_ref    : [Tc*B, I]   streamed chunk of time-major, batch-padded inputs
    wih_hbm  : [I, 3Hp]    fused input weights (r|z|n) in HBM (copied once to VMEM)
    whh_hbm  : [Hp, 3Hp]   fused hidden weights (r|z|n) in HBM (copied once to VMEM)
    bi_ref   : [1, 3Hp]    [b_ir+b_hr | b_iz+b_hz | b_in]
    bhn_ref  : [1, Hp]     b_hn (stays inside the r * (...) term)
    out_ref  : [B, Hp]     h_T (written on the last chunk only)
    gi_scr   : [Tc*B, 3Hp] precomputed input projections for the chunk
    h_scr    : [B, Hp]     f32 hidden-state carry across chunks
    wih_scr / whh_scr      single-buffered VMEM-resident weights
    sem      : DMA semaphores for the one-time weight copy
    """
    c = pl.program_id(0)
    nc = pl.num_programs(0)
    B = batch
    Tc = chunk_len
    H = hidden  # padded hidden width (multiple of 128)

    @pl.when(c == 0)
    def _():
        h_scr[...] = jnp.zeros_like(h_scr)
        cp_i = pltpu.make_async_copy(wih_hbm, wih_scr, sem.at[0])
        cp_h = pltpu.make_async_copy(whh_hbm, whh_scr, sem.at[1])
        cp_i.start()
        cp_h.start()
        cp_i.wait()
        cp_h.wait()

    # ---- Phase 1: fused input projection for the whole chunk (one MXU problem) ----
    gi = jnp.dot(x_ref[...], wih_scr[...], preferred_element_type=jnp.float32)
    gi_scr[...] = (gi + bi_ref[...].astype(jnp.float32)).astype(gi_scr.dtype)

    # ---- Phase 2: serial recurrence (h lives in vregs; ONE fused matmul per step) ----
    whh_cat = whh_scr[...]
    bhn = jnp.broadcast_to(bhn_ref[...].astype(jnp.float32), (B, H))  # hoisted
    t0 = c * Tc
    padded_time = (seq_len % Tc) != 0  # static python bool

    def step(t, h):
        off = pl.multiple_of(t * B, row_align)
        gi_t = gi_scr[pl.ds(off, B), :].astype(jnp.float32)            # [B, 3H]
        gh = jnp.dot(h.astype(whh_cat.dtype), whh_cat,
                     preferred_element_type=jnp.float32)               # [B, 3H]
        r = jax.nn.sigmoid(gi_t[:, 0:H] + gh[:, 0:H])
        z = jax.nn.sigmoid(gi_t[:, H:2 * H] + gh[:, H:2 * H])
        n = jnp.tanh(gi_t[:, 2 * H:3 * H] + r * (gh[:, 2 * H:3 * H] + bhn))
        h_new = n + z * (h - n)                                        # == (1-z)*n + z*h
        if padded_time:  # only emitted when S was padded up to a chunk multiple
            h_new = jnp.where(t0 + t < seq_len, h_new, h)
        return h_new

    h = lax.fori_loop(0, Tc, step, h_scr[...], unroll=unroll)
    h_scr[...] = h

    @pl.when(c == nc - 1)
    def _():
        out_ref[...] = h.astype(out_ref.dtype)


@functools.partial(jax.jit, static_argnames=("chunk", "compute_dtype"))
def gru_encoder_forward(x, w_ih, w_hh, b_ih, b_hh, *, chunk=256,
                        compute_dtype=jnp.bfloat16):
    """x: [batch, seq, in_size]; returns [batch, hidden] (== GRUEncoder.forward)."""
    B, S, I = x.shape
    H = w_hh.shape[1]
    out_dtype = x.dtype

    Hp = _round_up(H, 128)               # lane-aligned gate blocks
    B_pad = _round_up(max(B, 1), 8)      # sublane-aligned per-timestep slabs

    Tc = min(chunk, S)
    num_chunks = pl.cdiv(S, Tc)
    S_pad = num_chunks * Tc

    # ---- inputs: time-major, batch-padded, flattened, compute dtype ----
    xc = x.astype(compute_dtype)
    if B_pad != B:
        xc = jnp.pad(xc, ((0, B_pad - B), (0, 0), (0, 0)))
    x_flat = jnp.transpose(xc, (1, 0, 2)).reshape(S * B_pad, I)
    if S_pad != S:
        x_flat = jnp.pad(x_flat, ((0, (S_pad - S) * B_pad), (0, 0)))

    # ---- weights: fused gate layout [*, 3*Hp] (gate blocks r|z|n), zero-padded ----
    w_ih3 = jnp.pad(w_ih.reshape(3, H, I), ((0, 0), (0, Hp - H), (0, 0)))  # [3,Hp,I]
    w_hh3 = jnp.pad(w_hh.reshape(3, H, H), ((0, 0), (0, Hp - H), (0, Hp - H)))
    wih_cat = jnp.transpose(w_ih3, (2, 0, 1)).reshape(I, 3 * Hp).astype(compute_dtype)
    whh_cat = jnp.transpose(w_hh3, (2, 0, 1)).reshape(Hp, 3 * Hp).astype(compute_dtype)

    b_ih3 = jnp.pad(b_ih.reshape(3, H), ((0, 0), (0, Hp - H)))
    b_hh3 = jnp.pad(b_hh.reshape(3, H), ((0, 0), (0, Hp - H)))
    # r/z biases fold into the precomputed input projection; b_hn stays inside r*(...).
    bi_cat = jnp.stack([b_ih3[0] + b_hh3[0], b_ih3[1] + b_hh3[1], b_ih3[2]],
                       axis=0).reshape(1, 3 * Hp).astype(jnp.float32)
    bhn = b_hh3[2].reshape(1, Hp).astype(jnp.float32)

    # gi scratch in bf16 only when the per-timestep row slab stays 16-row aligned
    # (packed-dtype sublane tiles); otherwise keep f32 (always f32 for f32 compute).
    gi_dtype = compute_dtype if (B_pad % 16 == 0) else jnp.float32
    row_align = 16 if (B_pad % 16 == 0) else 8

    # H-aware unroll: keep live vregs per unrolled step under control.
    unroll = max(1, min(8, 2048 // max(Hp, 1), Tc))

    # ---- VMEM budget derived from actual buffer sizes (capped at physical VMEM) ----
    cbytes = jnp.dtype(compute_dtype).itemsize
    gbytes = jnp.dtype(gi_dtype).itemsize
    obytes = jnp.dtype(out_dtype).itemsize
    needed = (2 * Tc * B_pad * I * cbytes          # double-buffered streamed x chunk
              + Tc * B_pad * 3 * Hp * gbytes       # gi scratch
              + (I + Hp) * 3 * Hp * cbytes         # single-buffered resident weights
              + 2 * (4 * Hp) * 4                   # double-buffered small biases
              + B_pad * Hp * 4                     # hidden-state carry
              + 2 * B_pad * Hp * obytes)           # resident output block
    try:
        phys_vmem = int(pltpu.get_tpu_info().vmem_capacity_bytes)
    except Exception:
        phys_vmem = 64 * 1024 * 1024
    vmem_limit = int(max(min(needed + (4 << 20), phys_vmem), 16 << 20))

    cost = pl.CostEstimate(
        flops=2 * S_pad * B_pad * 3 * Hp * (I + Hp),
        transcendentals=3 * S_pad * B_pad * Hp,
        bytes_accessed=int(x_flat.size * cbytes
                           + (wih_cat.size + whh_cat.size) * cbytes
                           + (bi_cat.size + bhn.size) * 4
                           + B_pad * Hp * obytes))

    kernel = functools.partial(
        _gru_kernel, seq_len=S, chunk_len=Tc, batch=B_pad, hidden=Hp,
        unroll=unroll, row_align=row_align)

    out = pl.pallas_call(
        kernel,
        out_shape=jax.ShapeDtypeStruct((B_pad, Hp), out_dtype),
        grid_spec=pltpu.PrefetchScalarGridSpec(
            num_scalar_prefetch=0,
            grid=(num_chunks,),
            in_specs=[
                pl.BlockSpec((Tc * B_pad, I), lambda c: (c, 0)),  # streamed x chunk
                pl.BlockSpec(memory_space=pl.ANY),                # wih: one-time DMA
                pl.BlockSpec(memory_space=pl.ANY),                # whh: one-time DMA
                pl.BlockSpec((1, 3 * Hp), lambda c: (0, 0)),      # fused r/z/n bias
                pl.BlockSpec((1, Hp), lambda c: (0, 0)),          # b_hn
            ],
            out_specs=pl.BlockSpec((B_pad, Hp), lambda c: (0, 0)),
            scratch_shapes=[
                pltpu.VMEM((Tc * B_pad, 3 * Hp), gi_dtype),   # gi for the chunk
                pltpu.VMEM((B_pad, Hp), jnp.float32),         # hidden-state carry
                pltpu.VMEM((I, 3 * Hp), compute_dtype),       # resident W_ih (1 copy)
                pltpu.VMEM((Hp, 3 * Hp), compute_dtype),      # resident W_hh (1 copy)
                pltpu.SemaphoreType.DMA((2,)),
            ]),
        compiler_params=pltpu.CompilerParams(
            dimension_semantics=("arbitrary",),
            vmem_limit_bytes=vmem_limit),
        cost_estimate=cost,
    )(x_flat, wih_cat, whh_cat, bi_cat, bhn)

    return out[:B, :H]


def _gru_reference(x, w_ih, w_hh, b_ih, b_hh):
    """Pure-JAX f32 reference (PyTorch GRU semantics) for the correctness check."""
    def cell(h, x_t):
        gi = x_t @ w_ih.T + b_ih
        gh = h @ w_hh.T + b_hh
        i_r, i_z, i_n = jnp.split(gi, 3, axis=-1)
        h_r, h_z, h_n = jnp.split(gh, 3, axis=-1)
        r = jax.nn.sigmoid(i_r + h_r)
        z = jax.nn.sigmoid(i_z + h_z)
        n = jnp.tanh(i_n + r * h_n)
        return (1.0 - z) * n + z * h, None

    B = x.shape[0]
    H = w_hh.shape[1]
    h0 = jnp.zeros((B, H), x.dtype)
    hT, _ = lax.scan(cell, h0, jnp.transpose(x, (1, 0, 2)))
    return hT


if __name__ == "__main__":
    # Small shapes consistent with the module: batch=2, seq=8, in_size=16, out_dim=32.
    B, S, I, H = 2, 8, 16, 32

    key = jax.random.PRNGKey(0)
    k_x, k_wih, k_whh, k_bih, k_bhh = jax.random.split(key, 5)

    # PyTorch-style uniform(-1/sqrt(H), 1/sqrt(H)) init, gate order (r, z, n).
    bound = 1.0 / np.sqrt(H)
    w_ih = jax.random.uniform(k_wih, (3 * H, I), jnp.float32, -bound, bound)
    w_hh = jax.random.uniform(k_whh, (3 * H, H), jnp.float32, -bound, bound)
    b_ih = jax.random.uniform(k_bih, (3 * H,), jnp.float32, -bound, bound)
    b_hh = jax.random.uniform(k_bhh, (3 * H,), jnp.float32, -bound, bound)

    x = jax.random.normal(k_x, (B, S, I), jnp.float32)

    out = jax.block_until_ready(gru_encoder_forward(x, w_ih, w_hh, b_ih, b_hh))
    ref = jax.block_until_ready(_gru_reference(x, w_ih, w_hh, b_ih, b_hh))

    assert out.shape == (B, H)
    # bf16 MXU operands (per perf review) -> loosened tolerance vs. the f32 reference.
    np.testing.assert_allclose(np.asarray(out), np.asarray(ref), rtol=3e-2, atol=3e-2)

    print("KERNEL_OK")
</pallas_src>

<mosaic_0001>
module attributes {stable_mosaic.version = 11 : i64} {
  func.func @_gru_kernel(%arg0: i32, %arg1: memref<64x16xbf16, #tpu.memory_space<vmem>>, %arg2: memref<16x384xbf16, #tpu.memory_space<any>>, %arg3: memref<128x384xbf16, #tpu.memory_space<any>>, %arg4: memref<1x384xf32, #tpu.memory_space<vmem>>, %arg5: memref<1x128xf32, #tpu.memory_space<vmem>>, %arg6: memref<8x128xf32, #tpu.memory_space<vmem>>, %arg7: memref<64x384xf32, #tpu.memory_space<vmem>>, %arg8: memref<8x128xf32, #tpu.memory_space<vmem>>, %arg9: memref<16x384xbf16, #tpu.memory_space<vmem>>, %arg10: memref<128x384xbf16, #tpu.memory_space<vmem>>, %arg11: memref<2x!tpu.dma_semaphore, #tpu.memory_space<semaphore_mem>>) attributes {dimension_semantics = [#tpu.dimension_semantics<arbitrary>], iteration_bounds = array<i64: 1>, scalar_prefetch = 0 : i64, scratch_operands = 5 : i64, tpu.core_type = #tpu.core_type<tc>, window_params = [{transform_indices = @transform_0, window_bounds = array<i64: 64, 16>}, {}, {}, {pipeline_mode = #tpu.pipeline_mode<synchronous>, transform_indices = @transform_3, window_bounds = array<i64: 1, 384>}, {pipeline_mode = #tpu.pipeline_mode<synchronous>, transform_indices = @transform_4, window_bounds = array<i64: 1, 128>}, {pipeline_mode = #tpu.pipeline_mode<synchronous>, transform_indices = @transform_5, window_bounds = array<i64: 8, 128>}]} {
    %c0_i32 = arith.constant 0 : i32
    %0 = arith.cmpi eq, %arg0, %c0_i32 : i32
    %1 = arith.extui %0 : i1 to i32
    %c0_i32_0 = arith.constant 0 : i32
    %2 = arith.cmpi ne, %1, %c0_i32_0 : i32
    scf.if %2 {
      %cst_59 = arith.constant 0.000000e+00 : f32
      %267 = vector.broadcast %cst_59 : f32 to vector<8x128xf32>
      %c0_60 = arith.constant 0 : index
      %c0_61 = arith.constant 0 : index
      %268 = vector.load %arg8[%c0_60, %c0_61] : memref<8x128xf32, #tpu.memory_space<vmem>>, vector<8x128xf32>
      tpu.vector_store %arg8[%c0_60, %c0_61], %267 {strides = array<i32>} : memref<8x128xf32, #tpu.memory_space<vmem>>, vector<8x128xf32>,
      %c0_i32_62 = arith.constant 0 : i32
      %269 = tpu.memref_slice %arg11[%c0_i32_62] : memref<2x!tpu.dma_semaphore, #tpu.memory_space<semaphore_mem>> -> memref<1x!tpu.dma_semaphore, #tpu.memory_space<semaphore_mem>>
      %270 = tpu.memref_squeeze %269 : memref<1x!tpu.dma_semaphore, #tpu.memory_space<semaphore_mem>> -> memref<!tpu.dma_semaphore, #tpu.memory_space<semaphore_mem>>
      tpu.enqueue_dma source(%arg2 : memref<16x384xbf16, #tpu.memory_space<any>>) target(%arg9 : memref<16x384xbf16, #tpu.memory_space<vmem>>) target_semaphore(%270 : memref<!tpu.dma_semaphore, #tpu.memory_space<semaphore_mem>>)
      %c1_i32_63 = arith.constant 1 : i32
      %271 = tpu.memref_slice %arg11[%c1_i32_63] : memref<2x!tpu.dma_semaphore, #tpu.memory_space<semaphore_mem>> -> memref<1x!tpu.dma_semaphore, #tpu.memory_space<semaphore_mem>>
      %272 = tpu.memref_squeeze %271 : memref<1x!tpu.dma_semaphore, #tpu.memory_space<semaphore_mem>> -> memref<!tpu.dma_semaphore, #tpu.memory_space<semaphore_mem>>
      tpu.enqueue_dma source(%arg3 : memref<128x384xbf16, #tpu.memory_space<any>>) target(%arg10 : memref<128x384xbf16, #tpu.memory_space<vmem>>) target_semaphore(%272 : memref<!tpu.dma_semaphore, #tpu.memory_space<semaphore_mem>>)
      %c0_i32_64 = arith.constant 0 : i32
      %273 = tpu.memref_slice %arg11[%c0_i32_64] : memref<2x!tpu.dma_semaphore, #tpu.memory_space<semaphore_mem>> -> memref<1x!tpu.dma_semaphore, #tpu.memory_space<semaphore_mem>>
      %274 = tpu.memref_squeeze %273 : memref<1x!tpu.dma_semaphore, #tpu.memory_space<semaphore_mem>> -> memref<!tpu.dma_semaphore, #tpu.memory_space<semaphore_mem>>
      tpu.wait_dma2 semaphore(%274 : memref<!tpu.dma_semaphore, #tpu.memory_space<semaphore_mem>>) src(%arg2 : memref<16x384xbf16, #tpu.memory_space<any>>) dst(%arg9 : memref<16x384xbf16, #tpu.memory_space<vmem>>)
      %c1_i32_65 = arith.constant 1 : i32
      %275 = tpu.memref_slice %arg11[%c1_i32_65] : memref<2x!tpu.dma_semaphore, #tpu.memory_space<semaphore_mem>> -> memref<1x!tpu.dma_semaphore, #tpu.memory_space<semaphore_mem>>
      %276 = tpu.memref_squeeze %275 : memref<1x!tpu.dma_semaphore, #tpu.memory_space<semaphore_mem>> -> memref<!tpu.dma_semaphore, #tpu.memory_space<semaphore_mem>>
      tpu.wait_dma2 semaphore(%276 : memref<!tpu.dma_semaphore, #tpu.memory_space<semaphore_mem>>) src(%arg3 : memref<128x384xbf16, #tpu.memory_space<any>>) dst(%arg10 : memref<128x384xbf16, #tpu.memory_space<vmem>>)
    } else {
    }
    %c0 = arith.constant 0 : index
    %c0_1 = arith.constant 0 : index
    %3 = vector.load %arg1[%c0, %c0_1] : memref<64x16xbf16, #tpu.memory_space<vmem>>, vector<64x16xbf16>
    %c0_2 = arith.constant 0 : index
    %c0_3 = arith.constant 0 : index
    %4 = vector.load %arg9[%c0_2, %c0_3] : memref<16x384xbf16, #tpu.memory_space<vmem>>, vector<16x384xbf16>
    %cst = arith.constant dense<0.000000e+00> : vector<64x384xf32>
    %5 = tpu.matmul %3, %4, %cst {dimension_numbers = #tpu.dot_dimension_numbers<[1], [0], [0], [1], [0, 0, 1, 1], [], []>} : vector<64x16xbf16>, vector<16x384xbf16>, vector<64x384xf32> -> vector<64x384xf32>
    %c0_4 = arith.constant 0 : index
    %c0_5 = arith.constant 0 : index
    %6 = vector.load %arg4[%c0_4, %c0_5] : memref<1x384xf32, #tpu.memory_space<vmem>>, vector<1x384xf32>
    %7 = vector.broadcast %6 : vector<1x384xf32> to vector<64x384xf32>
    %8 = arith.addf %5, %7 : vector<64x384xf32>
    %c0_6 = arith.constant 0 : index
    %c0_7 = arith.constant 0 : index
    %9 = vector.load %arg7[%c0_6, %c0_7] : memref<64x384xf32, #tpu.memory_space<vmem>>, vector<64x384xf32>
    tpu.vector_store %arg7[%c0_6, %c0_7], %8 {strides = array<i32>} : memref<64x384xf32, #tpu.memory_space<vmem>>, vector<64x384xf32>,
    %c0_8 = arith.constant 0 : index
    %c0_9 = arith.constant 0 : index
    %10 = vector.load %arg10[%c0_8, %c0_9] : memref<128x384xbf16, #tpu.memory_space<vmem>>, vector<128x384xbf16>
    %c0_10 = arith.constant 0 : index
    %c0_11 = arith.constant 0 : index
    %11 = vector.load %arg5[%c0_10, %c0_11] : memref<1x128xf32, #tpu.memory_space<vmem>>, vector<1x128xf32>
    %12 = vector.shape_cast %11 : vector<1x128xf32> to vector<1x128xf32>
    %13 = vector.broadcast %12 : vector<1x128xf32> to vector<8x128xf32>
    %c0_12 = arith.constant 0 : index
    %c0_13 = arith.constant 0 : index
    %14 = vector.load %arg8[%c0_12, %c0_13] : memref<8x128xf32, #tpu.memory_space<vmem>>, vector<8x128xf32>
    %c0_i32_14 = arith.constant 0 : i32
    %c8_i32 = arith.constant 8 : i32
    %15 = arith.muli %c0_i32_14, %c8_i32 : i32
    %16 = tpu.assume_multiple %15, 8 : i32
    %17 = arith.index_cast %16 : i32 to index
    %c0_15 = arith.constant 0 : index
    %18 = vector.load %arg7[%17, %c0_15] : memref<64x384xf32, #tpu.memory_space<vmem>>, vector<8x384xf32>
    %19 = arith.truncf %14 : vector<8x128xf32> to vector<8x128xbf16>
    %cst_16 = arith.constant dense<0.000000e+00> : vector<8x384xf32>
    %20 = tpu.matmul %19, %10, %cst_16 {dimension_numbers = #tpu.dot_dimension_numbers<[1], [0], [0], [1], [0, 0, 1, 1], [], []>} : vector<8x128xbf16>, vector<128x384xbf16>, vector<8x384xf32> -> vector<8x384xf32>
    %21 = vector.extract_strided_slice %18 {offsets = [0, 0], sizes = [8, 128], strides = [1, 1]} : vector<8x384xf32> to vector<8x128xf32>
    %22 = vector.extract_strided_slice %20 {offsets = [0, 0], sizes = [8, 128], strides = [1, 1]} : vector<8x384xf32> to vector<8x128xf32>
    %23 = arith.addf %21, %22 : vector<8x128xf32>
    %24 = arith.negf %23 : vector<8x128xf32>
    %25 = math.exp %24 : vector<8x128xf32>
    %cst_17 = arith.constant 1.000000e+00 : f32
    %26 = vector.broadcast %cst_17 : f32 to vector<8x128xf32>
    %27 = arith.addf %26, %25 : vector<8x128xf32>
    %28 = arith.divf %26, %27 : vector<8x128xf32>
    %29 = vector.extract_strided_slice %18 {offsets = [0, 128], sizes = [8, 128], strides = [1, 1]} : vector<8x384xf32> to vector<8x128xf32>
    %30 = vector.extract_strided_slice %20 {offsets = [0, 128], sizes = [8, 128], strides = [1, 1]} : vector<8x384xf32> to vector<8x128xf32>
    %31 = arith.addf %29, %30 : vector<8x128xf32>
    %32 = arith.negf %31 : vector<8x128xf32>
    %33 = math.exp %32 : vector<8x128xf32>
    %cst_18 = arith.constant 1.000000e+00 : f32
    %34 = vector.broadcast %cst_18 : f32 to vector<8x128xf32>
    %35 = arith.addf %34, %33 : vector<8x128xf32>
    %36 = arith.divf %34, %35 : vector<8x128xf32>
    %37 = vector.extract_strided_slice %18 {offsets = [0, 256], sizes = [8, 128], strides = [1, 1]} : vector<8x384xf32> to vector<8x128xf32>
    %38 = vector.extract_strided_slice %20 {offsets = [0, 256], sizes = [8, 128], strides = [1, 1]} : vector<8x384xf32> to vector<8x128xf32>
    %39 = arith.addf %38, %13 : vector<8x128xf32>
    %40 = arith.mulf %28, %39 : vector<8x128xf32>
    %41 = arith.addf %37, %40 : vector<8x128xf32>
    %42 = math.tanh %41 : vector<8x128xf32>
    %43 = arith.subf %14, %42 : vector<8x128xf32>
    %44 = arith.mulf %36, %43 : vector<8x128xf32>
    %45 = arith.addf %42, %44 : vector<8x128xf32>
    %c1_i32 = arith.constant 1 : i32
    %c8_i32_19 = arith.constant 8 : i32
    %46 = arith.muli %c1_i32, %c8_i32_19 : i32
    %47 = tpu.assume_multiple %46, 8 : i32
    %48 = arith.index_cast %47 : i32 to index
    %c0_20 = arith.constant 0 : index
    %49 = vector.load %arg7[%48, %c0_20] : memref<64x384xf32, #tpu.memory_space<vmem>>, vector<8x384xf32>
    %50 = arith.truncf %45 : vector<8x128xf32> to vector<8x128xbf16>
    %cst_21 = arith.constant dense<0.000000e+00> : vector<8x384xf32>
    %51 = tpu.matmul %50, %10, %cst_21 {dimension_numbers = #tpu.dot_dimension_numbers<[1], [0], [0], [1], [0, 0, 1, 1], [], []>} : vector<8x128xbf16>, vector<128x384xbf16>, vector<8x384xf32> -> vector<8x384xf32>
    %52 = vector.extract_strided_slice %49 {offsets = [0, 0], sizes = [8, 128], strides = [1, 1]} : vector<8x384xf32> to vector<8x128xf32>
    %53 = vector.extract_strided_slice %51 {offsets = [0, 0], sizes = [8, 128], strides = [1, 1]} : vector<8x384xf32> to vector<8x128xf32>
    %54 = arith.addf %52, %53 : vector<8x128xf32>
    %55 = arith.negf %54 : vector<8x128xf32>
    %56 = math.exp %55 : vector<8x128xf32>
    %cst_22 = arith.constant 1.000000e+00 : f32
    %57 = vector.broadcast %cst_22 : f32 to vector<8x128xf32>
    %58 = arith.addf %57, %56 : vector<8x128xf32>
    %59 = arith.divf %57, %58 : vector<8x128xf32>
    %60 = vector.extract_strided_slice %49 {offsets = [0, 128], sizes = [8, 128], strides = [1, 1]} : vector<8x384xf32> to vector<8x128xf32>
    %61 = vector.extract_strided_slice %51 {offsets = [0, 128], sizes = [8, 128], strides = [1, 1]} : vector<8x384xf32> to vector<8x128xf32>
    %62 = arith.addf %60, %61 : vector<8x128xf32>
    %63 = arith.negf %62 : vector<8x128xf32>
    %64 = math.exp %63 : vector<8x128xf32>
    %cst_23 = arith.constant 1.000000e+00 : f32
    %65 = vector.broadcast %cst_23 : f32 to vector<8x128xf32>
    %66 = arith.addf %65, %64 : vector<8x128xf32>
    %67 = arith.divf %65, %66 : vector<8x128xf32>
    %68 = vector.extract_strided_slice %49 {offsets = [0, 256], sizes = [8, 128], strides = [1, 1]} : vector<8x384xf32> to vector<8x128xf32>
    %69 = vector.extract_strided_slice %51 {offsets = [0, 256], sizes = [8, 128], strides = [1, 1]} : vector<8x384xf32> to vector<8x128xf32>
    %70 = arith.addf %69, %13 : vector<8x128xf32>
    %71 = arith.mulf %59, %70 : vector<8x128xf32>
    %72 = arith.addf %68, %71 : vector<8x128xf32>
    %73 = math.tanh %72 : vector<8x128xf32>
    %74 = arith.subf %45, %73 : vector<8x128xf32>
    %75 = arith.mulf %67, %74 : vector<8x128xf32>
    %76 = arith.addf %73, %75 : vector<8x128xf32>
    %c2_i32 = arith.constant 2 : i32
    %c8_i32_24 = arith.constant 8 : i32
    %77 = arith.muli %c2_i32, %c8_i32_24 : i32
    %78 = tpu.assume_multiple %77, 8 : i32
    %79 = arith.index_cast %78 : i32 to index
    %c0_25 = arith.constant 0 : index
    %80 = vector.load %arg7[%79, %c0_25] : memref<64x384xf32, #tpu.memory_space<vmem>>, vector<8x384xf32>
    %81 = arith.truncf %76 : vector<8x128xf32> to vector<8x128xbf16>
    %cst_26 = arith.constant dense<0.000000e+00> : vector<8x384xf32>
    %82 = tpu.matmul %81, %10, %cst_26 {dimension_numbers = #tpu.dot_dimension_numbers<[1], [0], [0], [1], [0, 0, 1, 1], [], []>} : vector<8x128xbf16>, vector<128x384xbf16>, vector<8x384xf32> -> vector<8x384xf32>
    %83 = vector.extract_strided_slice %80 {offsets = [0, 0], sizes = [8, 128], strides = [1, 1]} : vector<8x384xf32> to vector<8x128xf32>
    %84 = vector.extract_strided_slice %82 {offsets = [0, 0], sizes = [8, 128], strides = [1, 1]} : vector<8x384xf32> to vector<8x128xf32>
    %85 = arith.addf %83, %84 : vector<8x128xf32>
    %86 = arith.negf %85 : vector<8x128xf32>
    %87 = math.exp %86 : vector<8x128xf32>
    %cst_27 = arith.constant 1.000000e+00 : f32
    %88 = vector.broadcast %cst_27 : f32 to vector<8x128xf32>
    %89 = arith.addf %88, %87 : vector<8x128xf32>
    %90 = arith.divf %88, %89 : vector<8x128xf32>
    %91 = vector.extract_strided_slice %80 {offsets = [0, 128], sizes = [8, 128], strides = [1, 1]} : vector<8x384xf32> to vector<8x128xf32>
    %92 = vector.extract_strided_slice %82 {offsets = [0, 128], sizes = [8, 128], strides = [1, 1]} : vector<8x384xf32> to vector<8x128xf32>
    %93 = arith.addf %91, %92 : vector<8x128xf32>
    %94 = arith.negf %93 : vector<8x128xf32>
    %95 = math.exp %94 : vector<8x128xf32>
    %cst_28 = arith.constant 1.000000e+00 : f32
    %96 = vector.broadcast %cst_28 : f32 to vector<8x128xf32>
    %97 = arith.addf %96, %95 : vector<8x128xf32>
    %98 = arith.divf %96, %97 : vector<8x128xf32>
    %99 = vector.extract_strided_slice %80 {offsets = [0, 256], sizes = [8, 128], strides = [1, 1]} : vector<8x384xf32> to vector<8x128xf32>
    %100 = vector.extract_strided_slice %82 {offsets = [0, 256], sizes = [8, 128], strides = [1, 1]} : vector<8x384xf32> to vector<8x128xf32>
    %101 = arith.addf %100, %13 : vector<8x128xf32>
    %102 = arith.mulf %90, %101 : vector<8x128xf32>
    %103 = arith.addf %99, %102 : vector<8x128xf32>
    %104 = math.tanh %103 : vector<8x128xf32>
    %105 = arith.subf %76, %104 : vector<8x128xf32>
    %106 = arith.mulf %98, %105 : vector<8x128xf32>
    %107 = arith.addf %104, %106 : vector<8x128xf32>
    %c3_i32 = arith.constant 3 : i32
    %c8_i32_29 = arith.constant 8 : i32
    %108 = arith.muli %c3_i32, %c8_i32_29 : i32
    %109 = tpu.assume_multiple %108, 8 : i32
    %110 = arith.index_cast %109 : i32 to index
    %c0_30 = arith.constant 0 : index
    %111 = vector.load %arg7[%110, %c0_30] : memref<64x384xf32, #tpu.memory_space<vmem>>, vector<8x384xf32>
    %112 = arith.truncf %107 : vector<8x128xf32> to vector<8x128xbf16>
    %cst_31 = arith.constant dense<0.000000e+00> : vector<8x384xf32>
    %113 = tpu.matmul %112, %10, %cst_31 {dimension_numbers = #tpu.dot_dimension_numbers<[1], [0], [0], [1], [0, 0, 1, 1], [], []>} : vector<8x128xbf16>, vector<128x384xbf16>, vector<8x384xf32> -> vector<8x384xf32>
    %114 = vector.extract_strided_slice %111 {offsets = [0, 0], sizes = [8, 128], strides = [1, 1]} : vector<8x384xf32> to vector<8x128xf32>
    %115 = vector.extract_strided_slice %113 {offsets = [0, 0], sizes = [8, 128], strides = [1, 1]} : vector<8x384xf32> to vector<8x128xf32>
    %116 = arith.addf %114, %115 : vector<8x128xf32>
    %117 = arith.negf %116 : vector<8x128xf32>
    %118 = math.exp %117 : vector<8x128xf32>
    %cst_32 = arith.constant 1.000000e+00 : f32
    %119 = vector.broadcast %cst_32 : f32 to vector<8x128xf32>
    %120 = arith.addf %119, %118 : vector<8x128xf32>
    %121 = arith.divf %119, %120 : vector<8x128xf32>
    %122 = vector.extract_strided_slice %111 {offsets = [0, 128], sizes = [8, 128], strides = [1, 1]} : vector<8x384xf32> to vector<8x128xf32>
    %123 = vector.extract_strided_slice %113 {offsets = [0, 128], sizes = [8, 128], strides = [1, 1]} : vector<8x384xf32> to vector<8x128xf32>
    %124 = arith.addf %122, %123 : vector<8x128xf32>
    %125 = arith.negf %124 : vector<8x128xf32>
    %126 = math.exp %125 : vector<8x128xf32>
    %cst_33 = arith.constant 1.000000e+00 : f32
    %127 = vector.broadcast %cst_33 : f32 to vector<8x128xf32>
    %128 = arith.addf %127, %126 : vector<8x128xf32>
    %129 = arith.divf %127, %128 : vector<8x128xf32>
    %130 = vector.extract_strided_slice %111 {offsets = [0, 256], sizes = [8, 128], strides = [1, 1]} : vector<8x384xf32> to vector<8x128xf32>
    %131 = vector.extract_strided_slice %113 {offsets = [0, 256], sizes = [8, 128], strides = [1, 1]} : vector<8x384xf32> to vector<8x128xf32>
    %132 = arith.addf %131, %13 : vector<8x128xf32>
    %133 = arith.mulf %121, %132 : vector<8x128xf32>
    %134 = arith.addf %130, %133 : vector<8x128xf32>
    %135 = math.tanh %134 : vector<8x128xf32>
    %136 = arith.subf %107, %135 : vector<8x128xf32>
    %137 = arith.mulf %129, %136 : vector<8x128xf32>
    %138 = arith.addf %135, %137 : vector<8x128xf32>
    %c4_i32 = arith.constant 4 : i32
    %c8_i32_34 = arith.constant 8 : i32
    %139 = arith.muli %c4_i32, %c8_i32_34 : i32
    %140 = tpu.assume_multiple %139, 8 : i32
    %141 = arith.index_cast %140 : i32 to index
    %c0_35 = arith.constant 0 : index
    %142 = vector.load %arg7[%141, %c0_35] : memref<64x384xf32, #tpu.memory_space<vmem>>, vector<8x384xf32>
    %143 = arith.truncf %138 : vector<8x128xf32> to vector<8x128xbf16>
    %cst_36 = arith.constant dense<0.000000e+00> : vector<8x384xf32>
    %144 = tpu.matmul %143, %10, %cst_36 {dimension_numbers = #tpu.dot_dimension_numbers<[1], [0], [0], [1], [0, 0, 1, 1], [], []>} : vector<8x128xbf16>, vector<128x384xbf16>, vector<8x384xf32> -> vector<8x384xf32>
    %145 = vector.extract_strided_slice %142 {offsets = [0, 0], sizes = [8, 128], strides = [1, 1]} : vector<8x384xf32> to vector<8x128xf32>
    %146 = vector.extract_strided_slice %144 {offsets = [0, 0], sizes = [8, 128], strides = [1, 1]} : vector<8x384xf32> to vector<8x128xf32>
    %147 = arith.addf %145, %146 : vector<8x128xf32>
    %148 = arith.negf %147 : vector<8x128xf32>
    %149 = math.exp %148 : vector<8x128xf32>
    %cst_37 = arith.constant 1.000000e+00 : f32
    %150 = vector.broadcast %cst_37 : f32 to vector<8x128xf32>
    %151 = arith.addf %150, %149 : vector<8x128xf32>
    %152 = arith.divf %150, %151 : vector<8x128xf32>
    %153 = vector.extract_strided_slice %142 {offsets = [0, 128], sizes = [8, 128], strides = [1, 1]} : vector<8x384xf32> to vector<8x128xf32>
    %154 = vector.extract_strided_slice %144 {offsets = [0, 128], sizes = [8, 128], strides = [1, 1]} : vector<8x384xf32> to vector<8x128xf32>
    %155 = arith.addf %153, %154 : vector<8x128xf32>
    %156 = arith.negf %155 : vector<8x128xf32>
    %157 = math.exp %156 : vector<8x128xf32>
    %cst_38 = arith.constant 1.000000e+00 : f32
    %158 = vector.broadcast %cst_38 : f32 to vector<8x128xf32>
    %159 = arith.addf %158, %157 : vector<8x128xf32>
    %160 = arith.divf %158, %159 : vector<8x128xf32>
    %161 = vector.extract_strided_slice %142 {offsets = [0, 256], sizes = [8, 128], strides = [1, 1]} : vector<8x384xf32> to vector<8x128xf32>
    %162 = vector.extract_strided_slice %144 {offsets = [0, 256], sizes = [8, 128], strides = [1, 1]} : vector<8x384xf32> to vector<8x128xf32>
    %163 = arith.addf %162, %13 : vector<8x128xf32>
    %164 = arith.mulf %152, %163 : vector<8x128xf32>
    %165 = arith.addf %161, %164 : vector<8x128xf32>
    %166 = math.tanh %165 : vector<8x128xf32>
    %167 = arith.subf %138, %166 : vector<8x128xf32>
    %168 = arith.mulf %160, %167 : vector<8x128xf32>
    %169 = arith.addf %166, %168 : vector<8x128xf32>
    %c5_i32 = arith.constant 5 : i32
    %c8_i32_39 = arith.constant 8 : i32
    %170 = arith.muli %c5_i32, %c8_i32_39 : i32
    %171 = tpu.assume_multiple %170, 8 : i32
    %172 = arith.index_cast %171 : i32 to index
    %c0_40 = arith.constant 0 : index
    %173 = vector.load %arg7[%172, %c0_40] : memref<64x384xf32, #tpu.memory_space<vmem>>, vector<8x384xf32>
    %174 = arith.truncf %169 : vector<8x128xf32> to vector<8x128xbf16>
    %cst_41 = arith.constant dense<0.000000e+00> : vector<8x384xf32>
    %175 = tpu.matmul %174, %10, %cst_41 {dimension_numbers = #tpu.dot_dimension_numbers<[1], [0], [0], [1], [0, 0, 1, 1], [], []>} : vector<8x128xbf16>, vector<128x384xbf16>, vector<8x384xf32> -> vector<8x384xf32>
    %176 = vector.extract_strided_slice %173 {offsets = [0, 0], sizes = [8, 128], strides = [1, 1]} : vector<8x384xf32> to vector<8x128xf32>
    %177 = vector.extract_strided_slice %175 {offsets = [0, 0], sizes = [8, 128], strides = [1, 1]} : vector<8x384xf32> to vector<8x128xf32>
    %178 = arith.addf %176, %177 : vector<8x128xf32>
    %179 = arith.negf %178 : vector<8x128xf32>
    %180 = math.exp %179 : vector<8x128xf32>
    %cst_42 = arith.constant 1.000000e+00 : f32
    %181 = vector.broadcast %cst_42 : f32 to vector<8x128xf32>
    %182 = arith.addf %181, %180 : vector<8x128xf32>
    %183 = arith.divf %181, %182 : vector<8x128xf32>
    %184 = vector.extract_strided_slice %173 {offsets = [0, 128], sizes = [8, 128], strides = [1, 1]} : vector<8x384xf32> to vector<8x128xf32>
    %185 = vector.extract_strided_slice %175 {offsets = [0, 128], sizes = [8, 128], strides = [1, 1]} : vector<8x384xf32> to vector<8x128xf32>
    %186 = arith.addf %184, %185 : vector<8x128xf32>
    %187 = arith.negf %186 : vector<8x128xf32>
    %188 = math.exp %187 : vector<8x128xf32>
    %cst_43 = arith.constant 1.000000e+00 : f32
    %189 = vector.broadcast %cst_43 : f32 to vector<8x128xf32>
    %190 = arith.addf %189, %188 : vector<8x128xf32>
    %191 = arith.divf %189, %190 : vector<8x128xf32>
    %192 = vector.extract_strided_slice %173 {offsets = [0, 256], sizes = [8, 128], strides = [1, 1]} : vector<8x384xf32> to vector<8x128xf32>
    %193 = vector.extract_strided_slice %175 {offsets = [0, 256], sizes = [8, 128], strides = [1, 1]} : vector<8x384xf32> to vector<8x128xf32>
    %194 = arith.addf %193, %13 : vector<8x128xf32>
    %195 = arith.mulf %183, %194 : vector<8x128xf32>
    %196 = arith.addf %192, %195 : vector<8x128xf32>
    %197 = math.tanh %196 : vector<8x128xf32>
    %198 = arith.subf %169, %197 : vector<8x128xf32>
    %199 = arith.mulf %191, %198 : vector<8x128xf32>
    %200 = arith.addf %197, %199 : vector<8x128xf32>
    %c6_i32 = arith.constant 6 : i32
    %c8_i32_44 = arith.constant 8 : i32
    %201 = arith.muli %c6_i32, %c8_i32_44 : i32
    %202 = tpu.assume_multiple %201, 8 : i32
    %203 = arith.index_cast %202 : i32 to index
    %c0_45 = arith.constant 0 : index
    %204 = vector.load %arg7[%203, %c0_45] : memref<64x384xf32, #tpu.memory_space<vmem>>, vector<8x384xf32>
    %205 = arith.truncf %200 : vector<8x128xf32> to vector<8x128xbf16>
    %cst_46 = arith.constant dense<0.000000e+00> : vector<8x384xf32>
    %206 = tpu.matmul %205, %10, %cst_46 {dimension_numbers = #tpu.dot_dimension_numbers<[1], [0], [0], [1], [0, 0, 1, 1], [], []>} : vector<8x128xbf16>, vector<128x384xbf16>, vector<8x384xf32> -> vector<8x384xf32>
    %207 = vector.extract_strided_slice %204 {offsets = [0, 0], sizes = [8, 128], strides = [1, 1]} : vector<8x384xf32> to vector<8x128xf32>
    %208 = vector.extract_strided_slice %206 {offsets = [0, 0], sizes = [8, 128], strides = [1, 1]} : vector<8x384xf32> to vector<8x128xf32>
    %209 = arith.addf %207, %208 : vector<8x128xf32>
    %210 = arith.negf %209 : vector<8x128xf32>
    %211 = math.exp %210 : vector<8x128xf32>
    %cst_47 = arith.constant 1.000000e+00 : f32
    %212 = vector.broadcast %cst_47 : f32 to vector<8x128xf32>
    %213 = arith.addf %212, %211 : vector<8x128xf32>
    %214 = arith.divf %212, %213 : vector<8x128xf32>
    %215 = vector.extract_strided_slice %204 {offsets = [0, 128], sizes = [8, 128], strides = [1, 1]} : vector<8x384xf32> to vector<8x128xf32>
    %216 = vector.extract_strided_slice %206 {offsets = [0, 128], sizes = [8, 128], strides = [1, 1]} : vector<8x384xf32> to vector<8x128xf32>
    %217 = arith.addf %215, %216 : vector<8x128xf32>
    %218 = arith.negf %217 : vector<8x128xf32>
    %219 = math.exp %218 : vector<8x128xf32>
    %cst_48 = arith.constant 1.000000e+00 : f32
    %220 = vector.broadcast %cst_48 : f32 to vector<8x128xf32>
    %221 = arith.addf %220, %219 : vector<8x128xf32>
    %222 = arith.divf %220, %221 : vector<8x128xf32>
    %223 = vector.extract_strided_slice %204 {offsets = [0, 256], sizes = [8, 128], strides = [1, 1]} : vector<8x384xf32> to vector<8x128xf32>
    %224 = vector.extract_strided_slice %206 {offsets = [0, 256], sizes = [8, 128], strides = [1, 1]} : vector<8x384xf32> to vector<8x128xf32>
    %225 = arith.addf %224, %13 : vector<8x128xf32>
    %226 = arith.mulf %214, %225 : vector<8x128xf32>
    %227 = arith.addf %223, %226 : vector<8x128xf32>
    %228 = math.tanh %227 : vector<8x128xf32>
    %229 = arith.subf %200, %228 : vector<8x128xf32>
    %230 = arith.mulf %222, %229 : vector<8x128xf32>
    %231 = arith.addf %228, %230 : vector<8x128xf32>
    %c7_i32 = arith.constant 7 : i32
    %c8_i32_49 = arith.constant 8 : i32
    %232 = arith.muli %c7_i32, %c8_i32_49 : i32
    %233 = tpu.assume_multiple %232, 8 : i32
    %234 = arith.index_cast %233 : i32 to index
    %c0_50 = arith.constant 0 : index
    %235 = vector.load %arg7[%234, %c0_50] : memref<64x384xf32, #tpu.memory_space<vmem>>, vector<8x384xf32>
    %236 = arith.truncf %231 : vector<8x128xf32> to vector<8x128xbf16>
    %cst_51 = arith.constant dense<0.000000e+00> : vector<8x384xf32>
    %237 = tpu.matmul %236, %10, %cst_51 {dimension_numbers = #tpu.dot_dimension_numbers<[1], [0], [0], [1], [0, 0, 1, 1], [], []>} : vector<8x128xbf16>, vector<128x384xbf16>, vector<8x384xf32> -> vector<8x384xf32>
    %238 = vector.extract_strided_slice %235 {offsets = [0, 0], sizes = [8, 128], strides = [1, 1]} : vector<8x384xf32> to vector<8x128xf32>
    %239 = vector.extract_strided_slice %237 {offsets = [0, 0], sizes = [8, 128], strides = [1, 1]} : vector<8x384xf32> to vector<8x128xf32>
    %240 = arith.addf %238, %239 : vector<8x128xf32>
    %241 = arith.negf %240 : vector<8x128xf32>
    %242 = math.exp %241 : vector<8x128xf32>
    %cst_52 = arith.constant 1.000000e+00 : f32
    %243 = vector.broadcast %cst_52 : f32 to vector<8x128xf32>
    %244 = arith.addf %243, %242 : vector<8x128xf32>
    %245 = arith.divf %243, %244 : vector<8x128xf32>
    %246 = vector.extract_strided_slice %235 {offsets = [0, 128], sizes = [8, 128], strides = [1, 1]} : vector<8x384xf32> to vector<8x128xf32>
    %247 = vector.extract_strided_slice %237 {offsets = [0, 128], sizes = [8, 128], strides = [1, 1]} : vector<8x384xf32> to vector<8x128xf32>
    %248 = arith.addf %246, %247 : vector<8x128xf32>
    %249 = arith.negf %248 : vector<8x128xf32>
    %250 = math.exp %249 : vector<8x128xf32>
    %cst_53 = arith.constant 1.000000e+00 : f32
    %251 = vector.broadcast %cst_53 : f32 to vector<8x128xf32>
    %252 = arith.addf %251, %250 : vector<8x128xf32>
    %253 = arith.divf %251, %252 : vector<8x128xf32>
    %254 = vector.extract_strided_slice %235 {offsets = [0, 256], sizes = [8, 128], strides = [1, 1]} : vector<8x384xf32> to vector<8x128xf32>
    %255 = vector.extract_strided_slice %237 {offsets = [0, 256], sizes = [8, 128], strides = [1, 1]} : vector<8x384xf32> to vector<8x128xf32>
    %256 = arith.addf %255, %13 : vector<8x128xf32>
    %257 = arith.mulf %245, %256 : vector<8x128xf32>
    %258 = arith.addf %254, %257 : vector<8x128xf32>
    %259 = math.tanh %258 : vector<8x128xf32>
    %260 = arith.subf %231, %259 : vector<8x128xf32>
    %261 = arith.mulf %253, %260 : vector<8x128xf32>
    %262 = arith.addf %259, %261 : vector<8x128xf32>
    %c8_i32_54 = arith.constant 8 : i32
    %c0_55 = arith.constant 0 : index
    %c0_56 = arith.constant 0 : index
    %263 = vector.load %arg8[%c0_55, %c0_56] : memref<8x128xf32, #tpu.memory_space<vmem>>, vector<8x128xf32>
    tpu.vector_store %arg8[%c0_55, %c0_56], %262 {strides = array<i32>} : memref<8x128xf32, #tpu.memory_space<vmem>>, vector<8x128xf32>,
    %c0_i32_57 = arith.constant 0 : i32
    %264 = arith.cmpi eq, %arg0, %c0_i32_57 : i32
    %265 = arith.extui %264 : i1 to i32
    %c0_i32_58 = arith.constant 0 : i32
    %266 = arith.cmpi ne, %265, %c0_i32_58 : i32
    scf.if %266 {
      %c0_59 = arith.constant 0 : index
      %c0_60 = arith.constant 0 : index
      %267 = vector.load %arg6[%c0_59, %c0_60] : memref<8x128xf32, #tpu.memory_space<vmem>>, vector<8x128xf32>
      tpu.vector_store %arg6[%c0_59, %c0_60], %262 {strides = array<i32>} : memref<8x128xf32, #tpu.memory_space<vmem>>, vector<8x128xf32>,
    } else {
    }
    return
  }
  func.func @transform_0(%arg0: i32) -> (i32, i32) {
    %c0_i32 = arith.constant 0 : i32
    %c0_i32_0 = arith.constant 0 : i32
    return %arg0, %c0_i32 : i32, i32
  }
  func.func @transform_3(%arg0: i32) -> (i32, i32) {
    %c0_i32 = arith.constant 0 : i32
    %c0_i32_0 = arith.constant 0 : i32
    %c0_i32_1 = arith.constant 0 : i32
    return %c0_i32, %c0_i32_0 : i32, i32
  }
  func.func @transform_4(%arg0: i32) -> (i32, i32) {
    %c0_i32 = arith.constant 0 : i32
    %c0_i32_0 = arith.constant 0 : i32
    %c0_i32_1 = arith.constant 0 : i32
    return %c0_i32, %c0_i32_0 : i32, i32
  }
  func.func @transform_5(%arg0: i32) -> (i32, i32) {
    %c0_i32 = arith.constant 0 : i32
    %c0_i32_0 = arith.constant 0 : i32
    %c0_i32_1 = arith.constant 0 : i32
    return %c0_i32, %c0_i32_0 : i32, i32
  }
}

</mosaic_0001>

<bundles_post_ra>
// kernel: gru_encoder_forward.1
= control target key start
LH: loop header
LB: loop body
LE: loop exit
PB: predicated region body
PF: predicated region fallthrough
CT: control target
= control target key end

     0   :  { %s2507_s0 = inlined_call_operand.vmem [shape: bf16[64,16], index: 0, kind: input, shape index: {}]   ;;  %s2508_s1 = inlined_call_operand.vmem [shape: bf16[16,384], index: 1, kind: input, shape index: {}]   ;;  %s2509_s2 = inlined_call_operand.vmem [shape: bf16[128,384], index: 2, kind: input, shape index: {}]   ;;  %s2510_s3 = inlined_call_operand.vmem [shape: f32[1,384], index: 3, kind: input, shape index: {}]   ;;  %s2511_s4 = inlined_call_operand.vmem [shape: f32[1,128], index: 4, kind: input, shape index: {}]   ;;  %s2512_s5 = inlined_call_operand.vmem [shape: f32[8,128], index: 5, kind: output, shape index: {}]  }
   0x1   :  { %v55_v0 = vld [vmem:[%s2508_s1] sm:$0xff]  ;;  %v57_v1 = vld [vmem:[%s2508_s1 + $0x8] sm:$0xff]  ;;  %v59_v2 = vld [vmem:[%s2508_s1 + $0x10] sm:$0xff] }
   0x2   :  { %56 = vst [vmem:[#allocation4] sm:$0xff] %v55_v0  ;;  %58 = vst [vmem:[#allocation4 + $0x8] sm:$0xff] %v57_v1 }
   0x3   :  { %60 = vst [vmem:[#allocation4 + $0x10] sm:$0xff] %v59_v2 }
   0x4   :  { %68 = vsyncadd [#allocation6], 384  ;;  %v103_v3 = vld [vmem:[%s2509_s2] sm:$0xff]  ;;  %v105_v4 = vld [vmem:[%s2509_s2 + $0x8] sm:$0xff] }
   0x5   :  { %104 = vst [vmem:[#allocation5] sm:$0xff] %v103_v3  ;;  %106 = vst [vmem:[#allocation5 + $0x8] sm:$0xff] %v105_v4  ;;  %v107_v5 = vld [vmem:[%s2509_s2 + $0x10] sm:$0xff]  ;;  %v109_v6 = vld [vmem:[%s2509_s2 + $0x18] sm:$0xff] }
   0x6   :  { %v111_v7 = vld [vmem:[%s2509_s2 + $0x20] sm:$0xff]  ;;  %108 = vst [vmem:[#allocation5 + $0x10] sm:$0xff] %v107_v5  ;;  %110 = vst [vmem:[#allocation5 + $0x18] sm:$0xff] %v109_v6  ;;  %v113_v8 = vld [vmem:[%s2509_s2 + $0x28] sm:$0xff] }
   0x7   :  { %112 = vst [vmem:[#allocation5 + $0x20] sm:$0xff] %v111_v7  ;;  %v115_v9 = vld [vmem:[%s2509_s2 + $0x30] sm:$0xff]  ;;  %v117_v10 = vld [vmem:[%s2509_s2 + $0x38] sm:$0xff]  ;;  %114 = vst [vmem:[#allocation5 + $0x28] sm:$0xff] %v113_v8 }
   0x8   :  { %116 = vst [vmem:[#allocation5 + $0x30] sm:$0xff] %v115_v9  ;;  %118 = vst [vmem:[#allocation5 + $0x38] sm:$0xff] %v117_v10  ;;  %v119_v11 = vld [vmem:[%s2509_s2 + $0x40] sm:$0xff]  ;;  %v121_v12 = vld [vmem:[%s2509_s2 + $0x48] sm:$0xff] }
   0x9   :  { %v123_v13 = vld [vmem:[%s2509_s2 + $0x50] sm:$0xff]  ;;  %120 = vst [vmem:[#allocation5 + $0x40] sm:$0xff] %v119_v11  ;;  %122 = vst [vmem:[#allocation5 + $0x48] sm:$0xff] %v121_v12  ;;  %v125_v14 = vld [vmem:[%s2509_s2 + $0x58] sm:$0xff] }
   0xa   :  { %124 = vst [vmem:[#allocation5 + $0x50] sm:$0xff] %v123_v13  ;;  %v127_v15 = vld [vmem:[%s2509_s2 + $0x60] sm:$0xff]  ;;  %v129_v16 = vld [vmem:[%s2509_s2 + $0x68] sm:$0xff]  ;;  %126 = vst [vmem:[#allocation5 + $0x58] sm:$0xff] %v125_v14 }
   0xb   :  { %128 = vst [vmem:[#allocation5 + $0x60] sm:$0xff] %v127_v15  ;;  %130 = vst [vmem:[#allocation5 + $0x68] sm:$0xff] %v129_v16  ;;  %v131_v17 = vld [vmem:[%s2509_s2 + $0x70] sm:$0xff]  ;;  %v133_v18 = vld [vmem:[%s2509_s2 + $0x78] sm:$0xff] }
   0xc   :  { %v135_v19 = vld [vmem:[%s2509_s2 + $0x80] sm:$0xff]  ;;  %132 = vst [vmem:[#allocation5 + $0x70] sm:$0xff] %v131_v17  ;;  %134 = vst [vmem:[#allocation5 + $0x78] sm:$0xff] %v133_v18  ;;  %v137_v20 = vld [vmem:[%s2509_s2 + $0x88] sm:$0xff] }
   0xd   :  { %136 = vst [vmem:[#allocation5 + $0x80] sm:$0xff] %v135_v19  ;;  %v139_v21 = vld [vmem:[%s2509_s2 + $0x90] sm:$0xff]  ;;  %v141_v22 = vld [vmem:[%s2509_s2 + $0x98] sm:$0xff]  ;;  %138 = vst [vmem:[#allocation5 + $0x88] sm:$0xff] %v137_v20 }
   0xe   :  { %140 = vst [vmem:[#allocation5 + $0x90] sm:$0xff] %v139_v21  ;;  %142 = vst [vmem:[#allocation5 + $0x98] sm:$0xff] %v141_v22  ;;  %v143_v23 = vld [vmem:[%s2509_s2 + $0xa0] sm:$0xff]  ;;  %v145_v24 = vld [vmem:[%s2509_s2 + $0xa8] sm:$0xff] }
   0xf   :  { %v147_v25 = vld [vmem:[%s2509_s2 + $0xb0] sm:$0xff]  ;;  %144 = vst [vmem:[#allocation5 + $0xa0] sm:$0xff] %v143_v23  ;;  %146 = vst [vmem:[#allocation5 + $0xa8] sm:$0xff] %v145_v24  ;;  %v149_v26 = vld [vmem:[%s2509_s2 + $0xb8] sm:$0xff] }
  0x10   :  { %148 = vst [vmem:[#allocation5 + $0xb0] sm:$0xff] %v147_v25  ;;  %150 = vst [vmem:[#allocation5 + $0xb8] sm:$0xff] %v149_v26 }
  0x11   :  { %158 = vsyncadd [#allocation6 + $0x1], 3072 }
  0x12   :  { %1939 = dma.done.wait [#allocation6], 384 }
  0x13   :  { %1940 = vsyncadd [#allocation6], 4294966912 }
  0x14   :  { %1941 = dma.done.wait [#allocation6 + $0x1], 3072 }
  0x15   :  { %1942 = vsyncadd [#allocation6 + $0x1], 4294964224  ;;  %v2513_v27 = vmov 0   ;;  %v1801_v28 = vld [vmem:[#allocation4 + $0x4] ss:$12 sps:$4 sm:$0xff]   ;;  %vm232_vm0 = vcmask 130048   ;;  %v181_v61 = vlaneseq }
  0x16   :  { %277 = vmatprep.mubr.bf16.mxu0 %v2513_v27  ;;  %v1803_v29 = vld [vmem:[#allocation4] ss:$12 sps:$4 sm:$0xff]   ;;  %259 = vmatprep.subr.bf16.mxu0 %v1801_v28  ;;  %v2072_v34 = vld [vmem:[#allocation5 + $0x90] ss:$12 sps:$4 sm:$0xff]   ;;  %v2082_v37 = vld [vmem:[#allocation5 + $0x78] ss:$12 sps:$4 sm:$0xff]  }
  0x17   :  { %v1804_v30 = vld [vmem:[%s2507_s0] sm:$0xff]   ;;  %260 = vmatpush1.bf16.msra.mxu0 %v1803_v29  ;;  %v2066_v33 = vld [vmem:[#allocation5 + $0x94] ss:$12 sps:$4 sm:$0xff]   ;;  %v2085_v38 = vld [vmem:[#allocation5 + $0x64] ss:$12 sps:$4 sm:$0xff]   ;;  %v2515_v44 = vmov 0.0  }
  0x18   :  { %v2062_v31 = vld [vmem:[#allocation5 + $0xac] ss:$12 sps:$4 sm:$0xff]   ;;  %v2064_v32 = vld [vmem:[#allocation5 + $0xa8] ss:$12 sps:$4 sm:$0xff]   ;;  %1629 = vmatprep.mubr.msk.bf16.mxu1 %vm232_vm0, %v1804_v30  ;;  %v1825_v39 = vld [vmem:[#allocation4 + $0x8] ss:$12 sps:$4 sm:$0xff]  }
  0x19   :  { %582 = vmatprep.subr.bf16.mxu0 %v2062_v31  ;;  %v2076_v35 = vld [vmem:[#allocation5 + $0x7c] ss:$12 sps:$4 sm:$0xff]   ;;  %v1811_v36 = vld [vmem:[%s2507_s0 + $0x8] sm:$0xff]   ;;  %v2089_v40 = vld [vmem:[#allocation5 + $0x60] ss:$12 sps:$4 sm:$0xff]   ;;  %1627 = vmatprep.subr.bf16.mxu1 %v1825_v39  ;;  %vm1945_vm1 = vmmov 0  }
  0x1a   :  { %1499 = vmatmul.mubr.msk.bf16.vlgmr.msra.gmra.mxu0 %vm232_vm0, %v1804_v30  ;;  %v2093_v41 = vld [vmem:[#allocation5 + $0x4c] ss:$12 sps:$4 sm:$0xff]   ;;  %1628 = vmatpush3.bf16.msra.mxu1 %v1825_v39  ;;  %v2095_v42 = vld [vmem:[#allocation5 + $0xb0] ss:$12 sps:$4 sm:$0xff]   ;;  %v2102_v45 = vld [vmem:[#allocation5 + $0x48] ss:$12 sps:$4 sm:$0xff]  }
  0x1b   :  { %583 = vmatpush1.bf16.msra.mxu0 %v2064_v32  ;;  %287 = vmatprep.mubr.bf16.mxu0 %v2513_v27  ;;  %v1818_v43 = vld [vmem:[%s2507_s0 + $0x10] sm:$0xff]   ;;  %v2105_v46 = vld [vmem:[#allocation5 + $0x34] ss:$12 sps:$4 sm:$0xff]   ;;  %v2132_v53 = vld [vmem:[#allocation5 + $0x4] ss:$12 sps:$4 sm:$0xff]   ;;  %v1946_v58 = vmov 0.0|0.0  }
  0x1c   :  { %584 = vmatprep.subr.bf16.mxu0 %v2066_v33  ;;  %1637 = vmatprep.subr.bf16.mxu1 %v2515_v44  ;;  %v2109_v47 = vld [vmem:[#allocation5 + $0x98] ss:$12 sps:$4 sm:$0xff]   ;;  %v2115_v48 = vld [vmem:[#allocation5 + $0x30] ss:$12 sps:$4 sm:$0xff]   ;;  %v2122_v50 = vld [vmem:[#allocation5 + $0x80] ss:$12 sps:$4 sm:$0xff]  }
  0x1d   :  { %1630 = vmatmul.mubr.msk.bf16.vlgmr.msra.gmra.mxu1 %vm232_vm0, %v1811_v36  ;;  %v2119_v49 = vld [vmem:[#allocation5 + $0x1c] ss:$12 sps:$4 sm:$0xff]   ;;  %v1826_v51 = vld [vmem:[%s2507_s0 + $0x18] sm:$0xff]   ;;  %v182_v62 = vshrl.u32 %v181_v61, 7 }
  0x1e   :  { %1638 = vmatpush3.bf16.msra.mxu1 %v2095_v42  ;;  %1633 = vmatprep.mubr.msk.bf16.mxu1 %vm232_vm0, %v1818_v43  ;;  %v2129_v52 = vld [vmem:[#allocation5 + $0x18] ss:$12 sps:$4 sm:$0xff]   ;;  %v2136_v54 = vld [vmem:[#allocation5 + $0x68] ss:$12 sps:$4 sm:$0xff]   ;;  %v2143_v55 = vld [vmem:[#allocation5] ss:$12 sps:$4 sm:$0xff]  }
  0x1f   :  { %585 = vmatpush1.bf16.msra.mxu0 %v2072_v34  ;;  %1639 = vmatprep.subr.bf16.mxu1 %v2515_v44  ;;  %v2148_v56 = vld [vmem:[#allocation5 + $0x50] ss:$12 sps:$4 sm:$0xff]   ;;  %v2154_v57 = vld [vmem:[#allocation5 + $0x38] ss:$12 sps:$4 sm:$0xff]   ;;  %v2161_v59 = vld [vmem:[#allocation5 + $0x20] ss:$12 sps:$4 sm:$0xff]  }
  0x20   :  { %586 = vmatprep.subr.bf16.mxu0 %v2076_v35  ;;  %v2167_v60 = vld [vmem:[#allocation5 + $0x8] ss:$12 sps:$4 sm:$0xff]   ;;  %v183_v63 = vsub.s32 0, %v182_v62  ;;  %v187_v2 = vsub.s32 1, %v182_v62  ;;  %v191_v10 = vsub.s32 2, %v182_v62 }
  0x21   :  { %v179_v0 = vld [vmem:[%s2510_s3] sm:$0x7] }
  0x22   :  { %1500 = vmatmul.mubr.msk.bf16.gmra.mxu0 %vm232_vm0, %v1811_v36  ;;  %1640 = vmatpush3.bf16.msra.mxu1 %v2109_v47  ;;  %v184_v4 = vrot.slane %v179_v0, %v183_v63  ;;  %v188_v6 = vrot.slane %v179_v0, %v187_v2  ;;  %v192_v15 = vrot.slane %v179_v0, %v191_v10 }
  0x23   :  { %587 = vmatpush1.bf16.msra.mxu0 %v2082_v37  ;;  %297 = vmatprep.mubr.bf16.mxu0 %v2513_v27 }
  0x24   :  { %588 = vmatprep.subr.bf16.mxu0 %v2085_v38  ;;  %1641 = vmatprep.subr.bf16.mxu1 %v2515_v44 }
  0x25   :  { %1634 = vmatmul.mubr.msk.bf16.gmra.mxu1 %vm232_vm0, %v1826_v51 }
  0x26   :  { %1642 = vmatpush3.bf16.msra.mxu1 %v2122_v50  ;;  %1653 = vmatprep.mubr.msk.bf16.mxu1 %vm1945_vm1, %v2515_v44 }
  0x27   :  { %589 = vmatpush1.bf16.msra.mxu0 %v2089_v40  ;;  %1643 = vmatprep.subr.bf16.mxu1 %v2515_v44 }
  0x28   :  { %590 = vmatprep.subr.bf16.mxu0 %v2093_v41 }
  0x2a   :  { %1501 = vmatmul.mubr.msk.bf16.gmra.mxu0 %vm232_vm0, %v1818_v43  ;;  %1644 = vmatpush3.bf16.msra.mxu1 %v2136_v54 }
  0x2b   :  { %591 = vmatpush1.bf16.msra.mxu0 %v2102_v45  ;;  %307 = vmatprep.mubr.bf16.mxu0 %v2513_v27 }
  0x2c   :  { %592 = vmatprep.subr.bf16.mxu0 %v2105_v46  ;;  %1645 = vmatprep.subr.bf16.mxu1 %v2515_v44 }
  0x2e   :  { %1646 = vmatpush3.bf16.msra.mxu1 %v2148_v56 }
  0x2f   :  { %593 = vmatpush1.bf16.msra.mxu0 %v2115_v48  ;;  %1647 = vmatprep.subr.bf16.mxu1 %v2515_v44 }
  0x30   :  { %594 = vmatprep.subr.bf16.mxu0 %v2119_v49 }
  0x32   :  { %1502 = vmatmul.mubr.msk.bf16.gmra.mxu0 %vm232_vm0, %v1826_v51  ;;  %1648 = vmatpush3.bf16.msra.mxu1 %v2154_v57 }
  0x33   :  { %595 = vmatpush1.bf16.msra.mxu0 %v2129_v52  ;;  %614 = vmatprep.mubr.bf16.mxu0 %v2513_v27 }
  0x34   :  { %596 = vmatprep.subr.bf16.mxu0 %v2132_v53  ;;  %1649 = vmatprep.subr.bf16.mxu1 %v2515_v44 }
  0x36   :  { %1650 = vmatpush3.bf16.msra.mxu1 %v2161_v59 }
  0x37   :  { %597 = vmatpush1.bf16.msra.mxu0 %v2143_v55  ;;  %1651 = vmatprep.subr.bf16.mxu1 %v2515_v44 }
  0x38   :  { %691 = vmatprep.subr.bf16.mxu0 %v2062_v31 }
  0x3a   :  { %615 = vmatmul.mubr.bf16.vlgmr.msra.gmra.mxu0 %v1946_v58  ;;  %1652 = vmatpush3.bf16.msra.mxu1 %v2167_v60 }
  0x3b   :  { %692 = vmatpush1.bf16.msra.mxu0 %v2064_v32  ;;  %723 = vmatprep.mubr.bf16.mxu0 %v2513_v27 }
  0x3c   :  { %693 = vmatprep.subr.bf16.mxu0 %v2066_v33  ;;  %1657 = vmatprep.subr.bf16.mxu1 %v2515_v44 }
  0x3d   :  { %1654 = vmatmul.mubr.bf16.vlgmr.msra.gmra.mxu1 %v1946_v58 }
  0x3e   :  { %1658 = vmatpush3.bf16.msra.mxu1 %v2095_v42  ;;  %1673 = vmatprep.mubr.msk.bf16.mxu1 %vm1945_vm1, %v2515_v44 }
  0x3f   :  { %694 = vmatpush1.bf16.msra.mxu0 %v2072_v34  ;;  %1659 = vmatprep.subr.bf16.mxu1 %v2515_v44 }
  0x40   :  { %695 = vmatprep.subr.bf16.mxu0 %v2076_v35 }
  0x42   :  { %1660 = vmatpush3.bf16.msra.mxu1 %v2109_v47 }
  0x43   :  { %696 = vmatpush1.bf16.msra.mxu0 %v2082_v37  ;;  %1661 = vmatprep.subr.bf16.mxu1 %v2515_v44 }
  0x44   :  { %697 = vmatprep.subr.bf16.mxu0 %v2085_v38 }
  0x46   :  { %1662 = vmatpush3.bf16.msra.mxu1 %v2122_v50 }
  0x47   :  { %698 = vmatpush1.bf16.msra.mxu0 %v2089_v40  ;;  %1663 = vmatprep.subr.bf16.mxu1 %v2515_v44 }
  0x48   :  { %699 = vmatprep.subr.bf16.mxu0 %v2093_v41 }
  0x4a   :  { %1664 = vmatpush3.bf16.msra.mxu1 %v2136_v54 }
  0x4b   :  { %700 = vmatpush1.bf16.msra.mxu0 %v2102_v45  ;;  %1665 = vmatprep.subr.bf16.mxu1 %v2515_v44 }
  0x4c   :  { %701 = vmatprep.subr.bf16.mxu0 %v2105_v46 }
  0x4e   :  { %1666 = vmatpush3.bf16.msra.mxu1 %v2148_v56 }
  0x4f   :  { %702 = vmatpush1.bf16.msra.mxu0 %v2115_v48  ;;  %1667 = vmatprep.subr.bf16.mxu1 %v2515_v44 }
  0x50   :  { %703 = vmatprep.subr.bf16.mxu0 %v2119_v49 }
  0x52   :  { %1668 = vmatpush3.bf16.msra.mxu1 %v2154_v57 }
  0x53   :  { %704 = vmatpush1.bf16.msra.mxu0 %v2129_v52  ;;  %1669 = vmatprep.subr.bf16.mxu1 %v2515_v44 }
  0x54   :  { %705 = vmatprep.subr.bf16.mxu0 %v2132_v53 }
  0x56   :  { %1670 = vmatpush3.bf16.msra.mxu1 %v2161_v59 }
  0x57   :  { %706 = vmatpush1.bf16.msra.mxu0 %v2143_v55  ;;  %1671 = vmatprep.subr.bf16.mxu1 %v2515_v44 }
  0x58   :  { %800 = vmatprep.subr.bf16.mxu0 %v2062_v31 }
  0x5a   :  { %1672 = vmatpush3.bf16.msra.mxu1 %v2167_v60 }
  0x5b   :  { %1677 = vmatprep.subr.bf16.mxu1 %v2515_v44 }
  0xda   :  { %v279_v1 = vpop.f32.mrf.mxu0 }
  0xdc   :  { %v281_v3 = vpop.f32.mrf.mxu0 }
  0xdd   :  { %v1631_v19 = vpop.f32.mrf.mxu1  ;;  %v282_v27 = vadd.f32 %v281_v3, %v188_v6 }
  0xde   :  { %v283_v5 = vpop.f32.mrf.mxu0  ;;  %v2217_v21 = vadd.f32 %v1631_v19, %v192_v15 }
  0xdf   :  { %v2205_v7 = vadd.f32 %v283_v5, %v184_v4  ;;  %v352_v23 = vpop.f32.mrf.mxu1 }
  0xe0   :  { %v285_v8 = vpop.f32.mrf.mxu0  ;;  %v353_v3 = vadd.f32 %v352_v23, %v192_v15 }
  0xe1   :  { %v2207_v9 = vadd.f32 %v285_v8, %v188_v6  ;;  %v1632_v26 = vpop.f32.mrf.mxu1 }
  0xe2   :  { %v289_v11 = vpop.f32.mrf.mxu0  ;;  %v2223_v29 = vadd.f32 %v1632_v26, %v192_v15  ;;  %v280_v26 = vadd.f32 %v279_v1, %v184_v4  ;;  %v2250_v1 = vld [vmem:[%s2511_s4] ss:$0 sm:$0xff] }
  0xe3   :  { %v2209_v12 = vadd.f32 %v289_v11, %v184_v4  ;;  %v355_v36 = vpop.f32.mrf.mxu1 }
  0xe4   :  { %v291_v13 = vpop.f32.mrf.mxu0  ;;  %v2227_v43 = vadd.f32 %v355_v36, %v192_v15 }
  0xe5   :  { %v2211_v14 = vadd.f32 %v291_v13, %v188_v6  ;;  %v1635_v58 = vpop.f32.mrf.mxu1 }
  0xe6   :  { %v293_v16 = vpop.f32.mrf.mxu0  ;;  %v2231_v62 = vadd.f32 %v1635_v58, %v192_v15 }
  0xe7   :  { %v2213_v17 = vadd.f32 %v293_v16, %v184_v4  ;;  %v368_v0 = vpop.f32.mrf.mxu1 }
  0xe8   :  { %v295_v18 = vpop.f32.mrf.mxu0  ;;  %2517 = vst [vmem:[#allocation11_spill] sm:$0xff] %v2231_v62  ;;  %v2235_v5 = vadd.f32 %v368_v0, %v192_v15 }
  0xe9   :  { %v2215_v20 = vadd.f32 %v295_v18, %v188_v6  ;;  %v1636_v10 = vpop.f32.mrf.mxu1 }
  0xea   :  { %v299_v22 = vpop.f32.mrf.mxu0  ;;  %v2239_v13 = vadd.f32 %v1636_v10, %v192_v15 }
  0xeb   :  { %v2219_v24 = vadd.f32 %v299_v22, %v184_v4  ;;  %v371_v18 = vpop.f32.mrf.mxu1 }
  0xec   :  { %v301_v25 = vpop.f32.mrf.mxu0  ;;  %2519 = vst [vmem:[#allocation13_spill] sm:$0xff] %v2239_v13  ;;  %v2243_v22 = vadd.f32 %v371_v18, %v192_v15  ;;  %v2522_v15 = vmov 0  }
  0xed   :  { %v2221_v28 = vadd.f32 %v301_v25, %v188_v6 }
  0xee   :  { %v303_v30 = vpop.f32.mrf.mxu0 }
  0xef   :  { %v2225_v39 = vadd.f32 %v303_v30, %v184_v4 }
  0xf0   :  { %v305_v51 = vpop.f32.mrf.mxu0 }
  0xf1   :  { %v2229_v61 = vadd.f32 %v305_v51, %v188_v6 }
  0xf2   :  { %v309_v63 = vpop.f32.mrf.mxu0 }
  0xf3   :  { %v2233_v2 = vadd.f32 %v309_v63, %v184_v4 }
  0xf4   :  { %v311_v8 = vpop.f32.mrf.mxu0 }
  0xf5   :  { %v2237_v11 = vadd.f32 %v311_v8, %v188_v6 }
  0xf6   :  { %v313_v16 = vpop.f32.mrf.mxu0 }
  0xf7   :  { %2518 = vst [vmem:[#allocation12_spill] sm:$0xff] %v2237_v11  ;;  %v2241_v19 = vadd.f32 %v313_v16, %v184_v4 }
  0xf8   :  { %v315_v25 = vpop.f32.mrf.mxu0 }
  0xf9   :  { %2520 = vst [vmem:[#allocation14_spill] sm:$0xff] %v2241_v19  ;;  %v2245_v30 = vadd.f32 %v315_v25, %v188_v6 }
  0xfa   :  { %v616_v36 = vpop.f32.mrf.mxu0 }
  0xfb   :  { %v663_v51 = vadd.f32 %v616_v36, %v280_v26 }
  0xfc   :  { %v618_v58 = vpop.f32.mrf.mxu0 }
  0xfd   :  { %v1532_v63 = vmul.f32 -1.442695, %v663_v51  ;;  %v670_v10 = vadd.f32 %v618_v58, %v282_v27  ;;  %v657_v44 = vpop.f32.mrf.mxu1 }
  0xfe   :  { %v620_v0 = vpop.f32.mrf.mxu0  ;;  %v677_v4 = vadd.f32 %v2250_v1, %v657_v44  ;;  %v2521_v44 = vmov 0.0  }
  0xff   :  { %1841 = vpow2.f32 %v1532_v63  ;;  %v1533_v13 = vmul.f32 -1.442695, %v670_v10  ;;  %v1655_v62 = vpop.f32.mrf.mxu1 }
 0x100   :  { %v621_v8 = vpop.f32.mrf.mxu0 }
 0x101   :  { %v660_v19 = vpop.f32.mrf.mxu1  ;;  %1843 = vpow2.f32 %v1533_v13 }
 0x103   :  { %v1656_v11 = vpop.f32.mrf.mxu1 }
 0x10c   :  { %v1842_v16 = vpop.eup %1841 }
 0x10d   :  { %v667_v18 = vadd.f32 1.0, %v1842_v16 }
 0x10e   :  { %v1844_v25 = vpop.eup %1843 }
 0x10f   :  { %1845 = vrcp.f32 %v667_v18  ;;  %v674_v6 = vadd.f32 1.0, %v1844_v25 }
 0x11c   :  { %v1846_v26 = vpop.eup %1845 }
 0x11d   :  { %v678_v27 = vmul.f32 %v1846_v26, %v677_v4 }
 0x11f   :  { %v679_v36 = vadd.f32 %v678_v27, %v353_v3 }
 0x121   :  { %1847 = vtanh.f32 %v679_v36 }
 0x122   :  { %1849 = vrcp.f32 %v674_v6 }
 0x12e   :  { %v1848_v62 = vpop.eup %1847 }
 0x12f   :  { %v681_v19 = vsub.f32 0.0, %v1848_v62  ;;  %v1850_v13 = vpop.eup %1849 }
 0x131   :  { %v682_v11 = vmul.f32 %v1850_v13, %v681_v19 }
 0x133   :  { %v2253_v51 = vadd.f32 %v1848_v62, %v682_v11 }
 0x135   :  { %v690_v58 = vpack.c.bf16 %v2253_v51, %v2253_v51 }
 0x137   :  { %724 = vmatmul.mubr.bf16.vlgmr.msra.gmra.mxu0 %v690_v58  ;;  %1674 = vmatmul.mubr.bf16.vlgmr.msra.gmra.mxu1 %v690_v58 }
 0x138   :  { %801 = vmatpush1.bf16.msra.mxu0 %v2064_v32  ;;  %1678 = vmatpush3.bf16.msra.mxu1 %v2095_v42 }
 0x139   :  { %802 = vmatprep.subr.bf16.mxu0 %v2066_v33  ;;  %1679 = vmatprep.subr.bf16.mxu1 %v2521_v44 }
 0x13a   :  { %832 = vmatprep.mubr.bf16.mxu0 %v2522_v15  ;;  %1693 = vmatprep.mubr.msk.bf16.mxu1 %vm1945_vm1, %v2521_v44 }
 0x13c   :  { %803 = vmatpush1.bf16.msra.mxu0 %v2072_v34  ;;  %1680 = vmatpush3.bf16.msra.mxu1 %v2109_v47 }
 0x13d   :  { %804 = vmatprep.subr.bf16.mxu0 %v2076_v35  ;;  %1681 = vmatprep.subr.bf16.mxu1 %v2521_v44 }
 0x140   :  { %805 = vmatpush1.bf16.msra.mxu0 %v2082_v37  ;;  %1682 = vmatpush3.bf16.msra.mxu1 %v2122_v50 }
 0x141   :  { %806 = vmatprep.subr.bf16.mxu0 %v2085_v38  ;;  %1683 = vmatprep.subr.bf16.mxu1 %v2521_v44 }
 0x144   :  { %807 = vmatpush1.bf16.msra.mxu0 %v2089_v40  ;;  %1684 = vmatpush3.bf16.msra.mxu1 %v2136_v54 }
 0x145   :  { %808 = vmatprep.subr.bf16.mxu0 %v2093_v41  ;;  %1685 = vmatprep.subr.bf16.mxu1 %v2521_v44 }
 0x148   :  { %809 = vmatpush1.bf16.msra.mxu0 %v2102_v45  ;;  %1686 = vmatpush3.bf16.msra.mxu1 %v2148_v56 }
 0x149   :  { %810 = vmatprep.subr.bf16.mxu0 %v2105_v46  ;;  %1687 = vmatprep.subr.bf16.mxu1 %v2521_v44 }
 0x14c   :  { %811 = vmatpush1.bf16.msra.mxu0 %v2115_v48  ;;  %1688 = vmatpush3.bf16.msra.mxu1 %v2154_v57 }
 0x14d   :  { %812 = vmatprep.subr.bf16.mxu0 %v2119_v49  ;;  %1689 = vmatprep.subr.bf16.mxu1 %v2521_v44 }
 0x150   :  { %813 = vmatpush1.bf16.msra.mxu0 %v2129_v52  ;;  %1690 = vmatpush3.bf16.msra.mxu1 %v2161_v59 }
 0x151   :  { %814 = vmatprep.subr.bf16.mxu0 %v2132_v53  ;;  %1691 = vmatprep.subr.bf16.mxu1 %v2521_v44 }
 0x154   :  { %815 = vmatpush1.bf16.msra.mxu0 %v2143_v55  ;;  %1692 = vmatpush3.bf16.msra.mxu1 %v2167_v60 }
 0x155   :  { %909 = vmatprep.subr.bf16.mxu0 %v2062_v31  ;;  %1697 = vmatprep.subr.bf16.mxu1 %v2521_v44 }
 0x1f7   :  { %v725_v23 = vpop.f32.mrf.mxu0  ;;  %v766_v63 = vpop.f32.mrf.mxu1 }
 0x1f8   :  { %v772_v0 = vadd.f32 %v725_v23, %v2205_v7  ;;  %v786_v19 = vadd.f32 %v2250_v1, %v766_v63 }
 0x1f9   :  { %v727_v8 = vpop.f32.mrf.mxu0  ;;  %v1675_v10 = vpop.f32.mrf.mxu1 }
 0x1fa   :  { %v1534_v16 = vmul.f32 -1.442695, %v772_v0  ;;  %v779_v3 = vadd.f32 %v727_v8, %v2207_v9 }
 0x1fb   :  { %v729_v18 = vpop.f32.mrf.mxu0  ;;  %v769_v4 = vpop.f32.mrf.mxu1 }
 0x1fc   :  { %1851 = vpow2.f32 %v1534_v16  ;;  %v1535_v27 = vmul.f32 -1.442695, %v779_v3 }
 0x1fd   :  { %v730_v25 = vpop.f32.mrf.mxu0  ;;  %v1676_v26 = vpop.f32.mrf.mxu1 }
 0x1fe   :  { %1853 = vpow2.f32 %v1535_v27 }
 0x209   :  { %v1852_v6 = vpop.eup %1851 }
 0x20a   :  { %v776_v36 = vadd.f32 1.0, %v1852_v6 }
 0x20b   :  { %v1854_v62 = vpop.eup %1853 }
 0x20c   :  { %1855 = vrcp.f32 %v776_v36  ;;  %v783_v58 = vadd.f32 1.0, %v1854_v62 }
 0x219   :  { %v1856_v13 = vpop.eup %1855 }
 0x21a   :  { %v787_v7 = vmul.f32 %v1856_v13, %v786_v19 }
 0x21c   :  { %v788_v11 = vadd.f32 %v787_v7, %v2227_v43 }
 0x21e   :  { %1857 = vtanh.f32 %v788_v11 }
 0x21f   :  { %1859 = vrcp.f32 %v783_v58 }
 0x22b   :  { %v1858_v23 = vpop.eup %1857 }
 0x22c   :  { %v790_v0 = vsub.f32 %v2253_v51, %v1858_v23  ;;  %v1860_v10 = vpop.eup %1859 }
 0x22e   :  { %v791_v9 = vmul.f32 %v1860_v10, %v790_v0 }
 0x230   :  { %v2297_v8 = vadd.f32 %v1858_v23, %v791_v9 }
 0x232   :  { %v799_v16 = vpack.c.bf16 %v2297_v8, %v2297_v8 }
 0x234   :  { %833 = vmatmul.mubr.bf16.vlgmr.msra.gmra.mxu0 %v799_v16  ;;  %1694 = vmatmul.mubr.bf16.vlgmr.msra.gmra.mxu1 %v799_v16 }
 0x235   :  { %910 = vmatpush1.bf16.msra.mxu0 %v2064_v32  ;;  %1698 = vmatpush3.bf16.msra.mxu1 %v2095_v42 }
 0x236   :  { %911 = vmatprep.subr.bf16.mxu0 %v2066_v33  ;;  %1699 = vmatprep.subr.bf16.mxu1 %v2521_v44 }
 0x237   :  { %941 = vmatprep.mubr.bf16.mxu0 %v2522_v15  ;;  %1713 = vmatprep.mubr.msk.bf16.mxu1 %vm1945_vm1, %v2521_v44 }
 0x239   :  { %912 = vmatpush1.bf16.msra.mxu0 %v2072_v34  ;;  %1700 = vmatpush3.bf16.msra.mxu1 %v2109_v47 }
 0x23a   :  { %913 = vmatprep.subr.bf16.mxu0 %v2076_v35  ;;  %1701 = vmatprep.subr.bf16.mxu1 %v2521_v44 }
 0x23d   :  { %914 = vmatpush1.bf16.msra.mxu0 %v2082_v37  ;;  %1702 = vmatpush3.bf16.msra.mxu1 %v2122_v50 }
 0x23e   :  { %915 = vmatprep.subr.bf16.mxu0 %v2085_v38  ;;  %1703 = vmatprep.subr.bf16.mxu1 %v2521_v44 }
 0x241   :  { %916 = vmatpush1.bf16.msra.mxu0 %v2089_v40  ;;  %1704 = vmatpush3.bf16.msra.mxu1 %v2136_v54 }
 0x242   :  { %917 = vmatprep.subr.bf16.mxu0 %v2093_v41  ;;  %1705 = vmatprep.subr.bf16.mxu1 %v2521_v44 }
 0x245   :  { %918 = vmatpush1.bf16.msra.mxu0 %v2102_v45  ;;  %1706 = vmatpush3.bf16.msra.mxu1 %v2148_v56 }
 0x246   :  { %919 = vmatprep.subr.bf16.mxu0 %v2105_v46  ;;  %1707 = vmatprep.subr.bf16.mxu1 %v2521_v44 }
 0x249   :  { %920 = vmatpush1.bf16.msra.mxu0 %v2115_v48  ;;  %1708 = vmatpush3.bf16.msra.mxu1 %v2154_v57 }
 0x24a   :  { %921 = vmatprep.subr.bf16.mxu0 %v2119_v49  ;;  %1709 = vmatprep.subr.bf16.mxu1 %v2521_v44 }
 0x24d   :  { %922 = vmatpush1.bf16.msra.mxu0 %v2129_v52  ;;  %1710 = vmatpush3.bf16.msra.mxu1 %v2161_v59 }
 0x24e   :  { %923 = vmatprep.subr.bf16.mxu0 %v2132_v53  ;;  %1711 = vmatprep.subr.bf16.mxu1 %v2521_v44 }
 0x251   :  { %924 = vmatpush1.bf16.msra.mxu0 %v2143_v55  ;;  %1712 = vmatpush3.bf16.msra.mxu1 %v2167_v60 }
 0x252   :  { %1018 = vmatprep.subr.bf16.mxu0 %v2062_v31  ;;  %1717 = vmatprep.subr.bf16.mxu1 %v2521_v44 }
 0x2f4   :  { %v834_v43 = vpop.f32.mrf.mxu0  ;;  %v875_v51 = vpop.f32.mrf.mxu1 }
 0x2f5   :  { %v881_v63 = vadd.f32 %v834_v43, %v2209_v12  ;;  %v895_v11 = vadd.f32 %v2250_v1, %v875_v51 }
 0x2f6   :  { %v836_v18 = vpop.f32.mrf.mxu0  ;;  %v1695_v4 = vpop.f32.mrf.mxu1 }
 0x2f7   :  { %v1536_v25 = vmul.f32 -1.442695, %v881_v63  ;;  %v888_v36 = vadd.f32 %v836_v18, %v2211_v14 }
 0x2f8   :  { %v838_v26 = vpop.f32.mrf.mxu0  ;;  %v878_v3 = vpop.f32.mrf.mxu1 }
 0x2f9   :  { %1861 = vpow2.f32 %v1536_v25  ;;  %v1537_v62 = vmul.f32 -1.442695, %v888_v36 }
 0x2fa   :  { %v839_v27 = vpop.f32.mrf.mxu0  ;;  %v1696_v6 = vpop.f32.mrf.mxu1 }
 0x2fb   :  { %1863 = vpow2.f32 %v1537_v62 }
 0x306   :  { %v1862_v19 = vpop.eup %1861 }
 0x307   :  { %v885_v13 = vadd.f32 1.0, %v1862_v19 }
 0x308   :  { %v1864_v7 = vpop.eup %1863 }
 0x309   :  { %1865 = vrcp.f32 %v885_v13  ;;  %v892_v0 = vadd.f32 1.0, %v1864_v7 }
 0x316   :  { %v1866_v58 = vpop.eup %1865 }
 0x317   :  { %v896_v12 = vmul.f32 %v1866_v58, %v895_v11 }
 0x319   :  { %v897_v23 = vadd.f32 %v896_v12, %v2217_v21 }
 0x31b   :  { %1867 = vtanh.f32 %v897_v23 }
 0x31c   :  { %1869 = vrcp.f32 %v892_v0 }
 0x328   :  { %v1868_v10 = vpop.eup %1867 }
 0x329   :  { %v899_v9 = vsub.f32 %v2297_v8, %v1868_v10  ;;  %v1870_v16 = vpop.eup %1869 }
 0x32b   :  { %v900_v14 = vmul.f32 %v1870_v16, %v899_v9 }
 0x32d   :  { %v2341_v43 = vadd.f32 %v1868_v10, %v900_v14 }
 0x32f   :  { %v908_v63 = vpack.c.bf16 %v2341_v43, %v2341_v43 }
 0x331   :  { %942 = vmatmul.mubr.bf16.vlgmr.msra.gmra.mxu0 %v908_v63  ;;  %1714 = vmatmul.mubr.bf16.vlgmr.msra.gmra.mxu1 %v908_v63 }
 0x332   :  { %1019 = vmatpush1.bf16.msra.mxu0 %v2064_v32  ;;  %1718 = vmatpush3.bf16.msra.mxu1 %v2095_v42 }
 0x333   :  { %1020 = vmatprep.subr.bf16.mxu0 %v2066_v33  ;;  %1719 = vmatprep.subr.bf16.mxu1 %v2521_v44 }
 0x334   :  { %1050 = vmatprep.mubr.bf16.mxu0 %v2522_v15  ;;  %1733 = vmatprep.mubr.msk.bf16.mxu1 %vm1945_vm1, %v2521_v44 }
 0x336   :  { %1021 = vmatpush1.bf16.msra.mxu0 %v2072_v34  ;;  %1720 = vmatpush3.bf16.msra.mxu1 %v2109_v47 }
 0x337   :  { %1022 = vmatprep.subr.bf16.mxu0 %v2076_v35  ;;  %1721 = vmatprep.subr.bf16.mxu1 %v2521_v44 }
 0x33a   :  { %1023 = vmatpush1.bf16.msra.mxu0 %v2082_v37  ;;  %1722 = vmatpush3.bf16.msra.mxu1 %v2122_v50 }
 0x33b   :  { %1024 = vmatprep.subr.bf16.mxu0 %v2085_v38  ;;  %1723 = vmatprep.subr.bf16.mxu1 %v2521_v44 }
 0x33e   :  { %1025 = vmatpush1.bf16.msra.mxu0 %v2089_v40  ;;  %1724 = vmatpush3.bf16.msra.mxu1 %v2136_v54 }
 0x33f   :  { %1026 = vmatprep.subr.bf16.mxu0 %v2093_v41  ;;  %1725 = vmatprep.subr.bf16.mxu1 %v2521_v44 }
 0x342   :  { %1027 = vmatpush1.bf16.msra.mxu0 %v2102_v45  ;;  %1726 = vmatpush3.bf16.msra.mxu1 %v2148_v56 }
 0x343   :  { %1028 = vmatprep.subr.bf16.mxu0 %v2105_v46  ;;  %1727 = vmatprep.subr.bf16.mxu1 %v2521_v44 }
 0x346   :  { %1029 = vmatpush1.bf16.msra.mxu0 %v2115_v48  ;;  %1728 = vmatpush3.bf16.msra.mxu1 %v2154_v57 }
 0x347   :  { %1030 = vmatprep.subr.bf16.mxu0 %v2119_v49  ;;  %1729 = vmatprep.subr.bf16.mxu1 %v2521_v44 }
 0x34a   :  { %1031 = vmatpush1.bf16.msra.mxu0 %v2129_v52  ;;  %1730 = vmatpush3.bf16.msra.mxu1 %v2161_v59 }
 0x34b   :  { %1032 = vmatprep.subr.bf16.mxu0 %v2132_v53  ;;  %1731 = vmatprep.subr.bf16.mxu1 %v2521_v44 }
 0x34e   :  { %1033 = vmatpush1.bf16.msra.mxu0 %v2143_v55  ;;  %1732 = vmatpush3.bf16.msra.mxu1 %v2167_v60 }
 0x34f   :  { %1127 = vmatprep.subr.bf16.mxu0 %v2062_v31  ;;  %1737 = vmatprep.subr.bf16.mxu1 %v2521_v44 }
 0x3f1   :  { %v943_v21 = vpop.f32.mrf.mxu0  ;;  %v984_v8 = vpop.f32.mrf.mxu1 }
 0x3f2   :  { %v990_v51 = vadd.f32 %v943_v21, %v2213_v17  ;;  %v1004_v11 = vadd.f32 %v2250_v1, %v984_v8 }
 0x3f3   :  { %v945_v18 = vpop.f32.mrf.mxu0  ;;  %v1715_v4 = vpop.f32.mrf.mxu1 }
 0x3f4   :  { %v1538_v25 = vmul.f32 -1.442695, %v990_v51  ;;  %v997_v36 = vadd.f32 %v945_v18, %v2215_v20 }
 0x3f5   :  { %v947_v26 = vpop.f32.mrf.mxu0  ;;  %v987_v3 = vpop.f32.mrf.mxu1 }
 0x3f6   :  { %1871 = vpow2.f32 %v1538_v25  ;;  %v1539_v62 = vmul.f32 -1.442695, %v997_v36 }
 0x3f7   :  { %v948_v27 = vpop.f32.mrf.mxu0  ;;  %v1716_v6 = vpop.f32.mrf.mxu1 }
 0x3f8   :  { %1873 = vpow2.f32 %v1539_v62 }
 0x403   :  { %v1872_v19 = vpop.eup %1871 }
 0x404   :  { %v994_v13 = vadd.f32 1.0, %v1872_v19 }
 0x405   :  { %v1874_v7 = vpop.eup %1873 }
 0x406   :  { %1875 = vrcp.f32 %v994_v13  ;;  %v1001_v23 = vadd.f32 1.0, %v1874_v7 }
 0x413   :  { %v1876_v58 = vpop.eup %1875 }
 0x414   :  { %v1005_v17 = vmul.f32 %v1876_v58, %v1004_v11 }
 0x416   :  { %v1006_v12 = vadd.f32 %v1005_v17, %v2223_v29 }
 0x418   :  { %1877 = vtanh.f32 %v1006_v12 }
 0x419   :  { %1879 = vrcp.f32 %v1001_v23  ;;  %v2433_v23 = vld [vmem:[#allocation5 + $0xa8] ss:$12 sps:$4 sm:$0xff]  }
 0x425   :  { %v1878_v0 = vpop.eup %1877 }
 0x426   :  { %v1008_v10 = vsub.f32 %v2341_v43, %v1878_v0  ;;  %v1880_v9 = vpop.eup %1879 }
 0x428   :  { %v1009_v20 = vmul.f32 %v1880_v9, %v1008_v10 }
 0x42a   :  { %v2385_v16 = vadd.f32 %v1878_v0, %v1009_v20 }
 0x42c   :  { %v1017_v14 = vpack.c.bf16 %v2385_v16, %v2385_v16 }
 0x42e   :  { %1051 = vmatmul.mubr.bf16.vlgmr.msra.gmra.mxu0 %v1017_v14  ;;  %1734 = vmatmul.mubr.bf16.vlgmr.msra.gmra.mxu1 %v1017_v14 }
 0x42f   :  { %1128 = vmatpush1.bf16.msra.mxu0 %v2064_v32  ;;  %1738 = vmatpush3.bf16.msra.mxu1 %v2095_v42 }
 0x430   :  { %1129 = vmatprep.subr.bf16.mxu0 %v2066_v33  ;;  %1739 = vmatprep.subr.bf16.mxu1 %v2521_v44 }
 0x431   :  { %1159 = vmatprep.mubr.bf16.mxu0 %v2522_v15  ;;  %1753 = vmatprep.mubr.msk.bf16.mxu1 %vm1945_vm1, %v2521_v44 }
 0x433   :  { %1130 = vmatpush1.bf16.msra.mxu0 %v2072_v34  ;;  %1740 = vmatpush3.bf16.msra.mxu1 %v2109_v47 }
 0x434   :  { %1131 = vmatprep.subr.bf16.mxu0 %v2076_v35  ;;  %1741 = vmatprep.subr.bf16.mxu1 %v2521_v44 }
 0x437   :  { %1132 = vmatpush1.bf16.msra.mxu0 %v2082_v37  ;;  %1742 = vmatpush3.bf16.msra.mxu1 %v2122_v50 }
 0x438   :  { %1133 = vmatprep.subr.bf16.mxu0 %v2085_v38  ;;  %1743 = vmatprep.subr.bf16.mxu1 %v2521_v44 }
 0x43b   :  { %1134 = vmatpush1.bf16.msra.mxu0 %v2089_v40  ;;  %1744 = vmatpush3.bf16.msra.mxu1 %v2136_v54 }
 0x43c   :  { %1135 = vmatprep.subr.bf16.mxu0 %v2093_v41  ;;  %1745 = vmatprep.subr.bf16.mxu1 %v2521_v44 }
 0x43f   :  { %1136 = vmatpush1.bf16.msra.mxu0 %v2102_v45  ;;  %1746 = vmatpush3.bf16.msra.mxu1 %v2148_v56 }
 0x440   :  { %1137 = vmatprep.subr.bf16.mxu0 %v2105_v46  ;;  %1747 = vmatprep.subr.bf16.mxu1 %v2521_v44 }
 0x443   :  { %1138 = vmatpush1.bf16.msra.mxu0 %v2115_v48  ;;  %1748 = vmatpush3.bf16.msra.mxu1 %v2154_v57 }
 0x444   :  { %1139 = vmatprep.subr.bf16.mxu0 %v2119_v49  ;;  %1749 = vmatprep.subr.bf16.mxu1 %v2521_v44 }
 0x447   :  { %1140 = vmatpush1.bf16.msra.mxu0 %v2129_v52  ;;  %1750 = vmatpush3.bf16.msra.mxu1 %v2161_v59 }
 0x448   :  { %1141 = vmatprep.subr.bf16.mxu0 %v2132_v53  ;;  %1751 = vmatprep.subr.bf16.mxu1 %v2521_v44 }
 0x44b   :  { %1142 = vmatpush1.bf16.msra.mxu0 %v2143_v55  ;;  %1752 = vmatpush3.bf16.msra.mxu1 %v2167_v60 }
 0x44c   :  { %1236 = vmatprep.subr.bf16.mxu0 %v2062_v31  ;;  %1757 = vmatprep.subr.bf16.mxu1 %v2521_v44 }
 0x4ee   :  { %v1052_v32 = vpop.f32.mrf.mxu0  ;;  %v1093_v29 = vpop.f32.mrf.mxu1 }
 0x4ef   :  { %v1099_v43 = vadd.f32 %v1052_v32, %v2219_v24  ;;  %v1113_v36 = vadd.f32 %v2250_v1, %v1093_v29 }
 0x4f0   :  { %v1054_v63 = vpop.f32.mrf.mxu0  ;;  %v1735_v21 = vpop.f32.mrf.mxu1 }
 0x4f1   :  { %v1540_v8 = vmul.f32 -1.442695, %v1099_v43  ;;  %v1106_v26 = vadd.f32 %v1054_v63, %v2221_v28  ;;  %v1923_v43 = vld [vmem:[#allocation5 + $0xb0] ss:$12 sps:$4 sm:$0xff]   ;;  %v1926_v21 = vld [vmem:[#allocation5 + $0x98] ss:$12 sps:$4 sm:$0xff]  }
 0x4f2   :  { %v1056_v51 = vpop.f32.mrf.mxu0  ;;  %v1096_v18 = vpop.f32.mrf.mxu1  ;;  %v1925_v63 = vld [vmem:[#allocation5 + $0x90] ss:$12 sps:$4 sm:$0xff]  }
 0x4f3   :  { %1881 = vpow2.f32 %v1540_v8  ;;  %v1541_v3 = vmul.f32 -1.442695, %v1106_v26  ;;  %v1927_v8 = vld [vmem:[#allocation5 + $0x7c] ss:$12 sps:$4 sm:$0xff]   ;;  %v1928_v51 = vld [vmem:[#allocation5 + $0x78] ss:$12 sps:$4 sm:$0xff]  }
 0x4f4   :  { %v1057_v4 = vpop.f32.mrf.mxu0  ;;  %v1736_v25 = vpop.f32.mrf.mxu1  ;;  %v1929_v18 = vld [vmem:[#allocation5 + $0x64] ss:$12 sps:$4 sm:$0xff]   ;;  %v1933_v26 = vld [vmem:[#allocation5 + $0x34] ss:$12 sps:$4 sm:$0xff]  }
 0x4f5   :  { %1883 = vpow2.f32 %v1541_v3  ;;  %v1931_v4 = vld [vmem:[#allocation5 + $0x4c] ss:$12 sps:$4 sm:$0xff]   ;;  %v1932_v25 = vld [vmem:[#allocation5 + $0x48] ss:$12 sps:$4 sm:$0xff]  }
 0x4f6   :  { %v1935_v3 = vld [vmem:[#allocation5 + $0x1c] ss:$12 sps:$4 sm:$0xff]  }
 0x500   :  { %v1882_v27 = vpop.eup %1881 }
 0x501   :  { %v1103_v6 = vadd.f32 1.0, %v1882_v27  ;;  %v1937_v27 = vld [vmem:[#allocation5 + $0x4] ss:$12 sps:$4 sm:$0xff]  }
 0x502   :  { %v1884_v31 = vpop.eup %1883 }
 0x503   :  { %1885 = vrcp.f32 %v1103_v6  ;;  %v1110_v13 = vadd.f32 1.0, %v1884_v31 }
 0x510   :  { %v1886_v62 = vpop.eup %1885 }
 0x511   :  { %v1114_v24 = vmul.f32 %v1886_v62, %v1113_v36 }
 0x513   :  { %v1115_v19 = vadd.f32 %v1114_v24, %v2235_v5 }
 0x515   :  { %1887 = vtanh.f32 %v1115_v19 }
 0x516   :  { %1889 = vrcp.f32 %v1110_v13 }
 0x522   :  { %v1888_v7 = vpop.eup %1887 }
 0x523   :  { %v1117_v11 = vsub.f32 %v2385_v16, %v1888_v7  ;;  %v1890_v58 = vpop.eup %1889 }
 0x525   :  { %v1118_v28 = vmul.f32 %v1890_v58, %v1117_v11  ;;  %v2523_v11 = vld [vmem:[#allocation12_spill] sm:$0xff] }
 0x527   :  { %v2429_v17 = vadd.f32 %v1888_v7, %v1118_v28 }
 0x529   :  { %v1126_v12 = vpack.c.bf16 %v2429_v17, %v2429_v17 }
 0x52b   :  { %1160 = vmatmul.mubr.bf16.vlgmr.msra.gmra.mxu0 %v1126_v12  ;;  %1754 = vmatmul.mubr.bf16.vlgmr.msra.gmra.mxu1 %v1126_v12 }
 0x52c   :  { %1237 = vmatpush1.bf16.msra.mxu0 %v2433_v23  ;;  %1758 = vmatpush3.bf16.msra.mxu1 %v2095_v42 }
 0x52d   :  { %1238 = vmatprep.subr.bf16.mxu0 %v2066_v33  ;;  %1759 = vmatprep.subr.bf16.mxu1 %v2521_v44  ;;  %v1922_v33 = vld [vmem:[#allocation5 + $0xac] ss:$12 sps:$4 sm:$0xff]  }
 0x52e   :  { %1268 = vmatprep.mubr.bf16.mxu0 %v2522_v15  ;;  %1773 = vmatprep.mubr.msk.bf16.mxu1 %vm1945_vm1, %v2521_v44 }
 0x530   :  { %1239 = vmatpush1.bf16.msra.mxu0 %v2072_v34  ;;  %1760 = vmatpush3.bf16.msra.mxu1 %v2109_v47 }
 0x531   :  { %1240 = vmatprep.subr.bf16.mxu0 %v2076_v35  ;;  %1761 = vmatprep.subr.bf16.mxu1 %v2521_v44 }
 0x534   :  { %1241 = vmatpush1.bf16.msra.mxu0 %v2082_v37  ;;  %1762 = vmatpush3.bf16.msra.mxu1 %v2122_v50 }
 0x535   :  { %1242 = vmatprep.subr.bf16.mxu0 %v2085_v38  ;;  %1763 = vmatprep.subr.bf16.mxu1 %v2521_v44 }
 0x538   :  { %1243 = vmatpush1.bf16.msra.mxu0 %v2089_v40  ;;  %1764 = vmatpush3.bf16.msra.mxu1 %v2136_v54 }
 0x539   :  { %1244 = vmatprep.subr.bf16.mxu0 %v2093_v41  ;;  %1765 = vmatprep.subr.bf16.mxu1 %v2521_v44 }
 0x53c   :  { %1245 = vmatpush1.bf16.msra.mxu0 %v2102_v45  ;;  %1766 = vmatpush3.bf16.msra.mxu1 %v2148_v56 }
 0x53d   :  { %1246 = vmatprep.subr.bf16.mxu0 %v2105_v46  ;;  %1767 = vmatprep.subr.bf16.mxu1 %v2521_v44 }
 0x540   :  { %1247 = vmatpush1.bf16.msra.mxu0 %v2115_v48  ;;  %1768 = vmatpush3.bf16.msra.mxu1 %v2154_v57 }
 0x541   :  { %1248 = vmatprep.subr.bf16.mxu0 %v2119_v49  ;;  %1769 = vmatprep.subr.bf16.mxu1 %v2521_v44 }
 0x544   :  { %1249 = vmatpush1.bf16.msra.mxu0 %v2129_v52  ;;  %1770 = vmatpush3.bf16.msra.mxu1 %v2161_v59 }
 0x545   :  { %1250 = vmatprep.subr.bf16.mxu0 %v2132_v53  ;;  %1771 = vmatprep.subr.bf16.mxu1 %v2521_v44 }
 0x548   :  { %1251 = vmatpush1.bf16.msra.mxu0 %v2143_v55  ;;  %1772 = vmatpush3.bf16.msra.mxu1 %v2167_v60 }
 0x549   :  { %1345 = vmatprep.subr.bf16.mxu0 %v1922_v33  ;;  %1777 = vmatprep.subr.bf16.mxu1 %v2521_v44  ;;  %v2524_v33 = vld [vmem:[#allocation11_spill] sm:$0xff] }
 0x5eb   :  { %v1161_v34 = vpop.f32.mrf.mxu0  ;;  %v1202_v35 = vpop.f32.mrf.mxu1 }
 0x5ec   :  { %v1208_v37 = vadd.f32 %v1161_v34, %v2225_v39  ;;  %v1222_v5 = vadd.f32 %v2250_v1, %v1202_v35 }
 0x5ed   :  { %v1163_v38 = vpop.f32.mrf.mxu0  ;;  %v1755_v40 = vpop.f32.mrf.mxu1 }
 0x5ee   :  { %v1542_v41 = vmul.f32 -1.442695, %v1208_v37  ;;  %v1215_v48 = vadd.f32 %v1163_v38, %v2229_v61 }
 0x5ef   :  { %v1165_v42 = vpop.f32.mrf.mxu0  ;;  %v1205_v45 = vpop.f32.mrf.mxu1 }
 0x5f0   :  { %1891 = vpow2.f32 %v1542_v41  ;;  %v1543_v49 = vmul.f32 -1.442695, %v1215_v48  ;;  %v2525_v48 = vld [vmem:[#allocation14_spill] sm:$0xff] }
 0x5f1   :  { %v1166_v46 = vpop.f32.mrf.mxu0  ;;  %v1756_v47 = vpop.f32.mrf.mxu1 }
 0x5f2   :  { %1893 = vpow2.f32 %v1543_v49 }
 0x5fd   :  { %v1892_v52 = vpop.eup %1891 }
 0x5fe   :  { %v1212_v53 = vadd.f32 1.0, %v1892_v52 }
 0x5ff   :  { %v1894_v55 = vpop.eup %1893 }
 0x600   :  { %1895 = vrcp.f32 %v1212_v53  ;;  %v1219_v9 = vadd.f32 1.0, %v1894_v55 }
 0x60d   :  { %v1896_v0 = vpop.eup %1895 }
 0x60e   :  { %v1223_v39 = vmul.f32 %v1896_v0, %v1222_v5 }
 0x610   :  { %v1224_v10 = vadd.f32 %v1223_v39, %v2243_v22  ;;  %v1924_v22 = vld [vmem:[#allocation5 + $0x94] ss:$12 sps:$4 sm:$0xff]  }
 0x612   :  { %1897 = vtanh.f32 %v1224_v10 }
 0x613   :  { %1899 = vrcp.f32 %v1219_v9 }
 0x61f   :  { %v1898_v20 = vpop.eup %1897 }
 0x620   :  { %v1226_v16 = vsub.f32 %v2429_v17, %v1898_v20  ;;  %v1900_v14 = vpop.eup %1899 }
 0x622   :  { %v1227_v61 = vmul.f32 %v1900_v14, %v1226_v16 }
 0x624   :  { %v2474_v32 = vadd.f32 %v1898_v20, %v1227_v61 }
 0x626   :  { %v1235_v29 = vpack.c.bf16 %v2474_v32, %v2474_v32 }
 0x628   :  { %1269 = vmatmul.mubr.bf16.vlgmr.msra.gmra.mxu0 %v1235_v29  ;;  %1774 = vmatmul.mubr.bf16.vlgmr.msra.gmra.mxu1 %v1235_v29 }
 0x629   :  { %1346 = vmatpush1.bf16.msra.mxu0 %v2433_v23  ;;  %1778 = vmatpush3.bf16.msra.mxu1 %v1923_v43 }
 0x62a   :  { %1347 = vmatprep.subr.bf16.mxu0 %v1924_v22  ;;  %1779 = vmatprep.subr.bf16.mxu1 %v2521_v44  ;;  %v2526_v22 = vld [vmem:[#allocation13_spill] sm:$0xff] }
 0x62b   :  { %1377 = vmatprep.mubr.bf16.mxu0 %v2522_v15  ;;  %1793 = vmatprep.mubr.msk.bf16.mxu1 %vm1945_vm1, %v2521_v44  ;;  %v1930_v15 = vld [vmem:[#allocation5 + $0x60] ss:$12 sps:$4 sm:$0xff]  }
 0x62d   :  { %1348 = vmatpush1.bf16.msra.mxu0 %v1925_v63  ;;  %1780 = vmatpush3.bf16.msra.mxu1 %v1926_v21 }
 0x62e   :  { %1349 = vmatprep.subr.bf16.mxu0 %v1927_v8  ;;  %1781 = vmatprep.subr.bf16.mxu1 %v2521_v44 }
 0x631   :  { %1350 = vmatpush1.bf16.msra.mxu0 %v1928_v51  ;;  %1782 = vmatpush3.bf16.msra.mxu1 %v2122_v50  ;;  %v1934_v50 = vld [vmem:[#allocation5 + $0x30] ss:$12 sps:$4 sm:$0xff]  }
 0x632   :  { %1351 = vmatprep.subr.bf16.mxu0 %v1929_v18  ;;  %1783 = vmatprep.subr.bf16.mxu1 %v2521_v44 }
 0x635   :  { %1352 = vmatpush1.bf16.msra.mxu0 %v1930_v15  ;;  %1784 = vmatpush3.bf16.msra.mxu1 %v2136_v54  ;;  %v1936_v54 = vld [vmem:[#allocation5 + $0x18] ss:$12 sps:$4 sm:$0xff]  }
 0x636   :  { %1353 = vmatprep.subr.bf16.mxu0 %v1931_v4  ;;  %1785 = vmatprep.subr.bf16.mxu1 %v2521_v44 }
 0x639   :  { %1354 = vmatpush1.bf16.msra.mxu0 %v1932_v25  ;;  %1786 = vmatpush3.bf16.msra.mxu1 %v2148_v56  ;;  %v1938_v56 = vld [vmem:[#allocation5] ss:$12 sps:$4 sm:$0xff]  }
 0x63a   :  { %1355 = vmatprep.subr.bf16.mxu0 %v1933_v26  ;;  %1787 = vmatprep.subr.bf16.mxu1 %v2521_v44 }
 0x63d   :  { %1356 = vmatpush1.bf16.msra.mxu0 %v1934_v50  ;;  %1788 = vmatpush3.bf16.msra.mxu1 %v2154_v57 }
 0x63e   :  { %1357 = vmatprep.subr.bf16.mxu0 %v1935_v3  ;;  %1789 = vmatprep.subr.bf16.mxu1 %v2521_v44 }
 0x641   :  { %1358 = vmatpush1.bf16.msra.mxu0 %v1936_v54  ;;  %1790 = vmatpush3.bf16.msra.mxu1 %v2161_v59 }
 0x642   :  { %1359 = vmatprep.subr.bf16.mxu0 %v1937_v27  ;;  %1791 = vmatprep.subr.bf16.mxu1 %v2521_v44 }
 0x645   :  { %1360 = vmatpush1.bf16.msra.mxu0 %v1938_v56  ;;  %1792 = vmatpush3.bf16.msra.mxu1 %v2167_v60 }
 0x6e8   :  { %v1270_v6 = vpop.f32.mrf.mxu0  ;;  %v1311_v31 = vpop.f32.mrf.mxu1 }
 0x6e9   :  { %v1317_v57 = vadd.f32 %v1270_v6, %v2233_v2  ;;  %v1331_v12 = vadd.f32 %v2250_v1, %v1311_v31 }
 0x6ea   :  { %v1272_v36 = vpop.f32.mrf.mxu0  ;;  %v1775_v62 = vpop.f32.mrf.mxu1 }
 0x6eb   :  { %v1544_v24 = vmul.f32 -1.442695, %v1317_v57  ;;  %v1324_v58 = vadd.f32 %v1272_v36, %v2523_v11 }
 0x6ec   :  { %v1274_v19 = vpop.f32.mrf.mxu0  ;;  %v1314_v13 = vpop.f32.mrf.mxu1 }
 0x6ed   :  { %1901 = vpow2.f32 %v1544_v24  ;;  %v1545_v28 = vmul.f32 -1.442695, %v1324_v58 }
 0x6ee   :  { %v1275_v7 = vpop.f32.mrf.mxu0  ;;  %v1776_v59 = vpop.f32.mrf.mxu1 }
 0x6ef   :  { %1903 = vpow2.f32 %v1545_v28 }
 0x6fa   :  { %v1902_v44 = vpop.eup %1901 }
 0x6fb   :  { %v1321_v17 = vadd.f32 1.0, %v1902_v44 }
 0x6fc   :  { %v1904_v60 = vpop.eup %1903 }
 0x6fd   :  { %1905 = vrcp.f32 %v1321_v17  ;;  %v1328_v35 = vadd.f32 1.0, %v1904_v60 }
 0x70a   :  { %v1906_v23 = vpop.eup %1905 }
 0x70b   :  { %v1332_v2 = vmul.f32 %v1906_v23, %v1331_v12 }
 0x70d   :  { %v1333_v34 = vadd.f32 %v1332_v2, %v2524_v33 }
 0x70f   :  { %1907 = vtanh.f32 %v1333_v34 }
 0x710   :  { %1909 = vrcp.f32 %v1328_v35 }
 0x71c   :  { %v1908_v37 = vpop.eup %1907 }
 0x71d   :  { %v1335_v38 = vsub.f32 %v2474_v32, %v1908_v37  ;;  %v1910_v40 = vpop.eup %1909 }
 0x71f   :  { %v1336_v41 = vmul.f32 %v1910_v40, %v1335_v38 }
 0x721   :  { %v1337_v42 = vadd.f32 %v1908_v37, %v1336_v41 }
 0x723   :  { %v1344_v45 = vpack.c.bf16 %v1337_v42, %v1337_v42 }
 0x725   :  { %1378 = vmatmul.mubr.bf16.vlgmr.msra.gmra.mxu0 %v1344_v45  ;;  %1794 = vmatmul.mubr.bf16.vlgmr.msra.gmra.mxu1 %v1344_v45 }
 0x7e5   :  { %v1379_v46 = vpop.f32.mrf.mxu0  ;;  %v1420_v47 = vpop.f32.mrf.mxu1 }
 0x7e6   :  { %v1426_v49 = vadd.f32 %v1379_v46, %v2525_v48  ;;  %v1440_v32 = vadd.f32 %v2250_v1, %v1420_v47 }
 0x7e7   :  { %v1381_v52 = vpop.f32.mrf.mxu0  ;;  %v1795_v53 = vpop.f32.mrf.mxu1 }
 0x7e8   :  { %v1546_v55 = vmul.f32 -1.442695, %v1426_v49  ;;  %v1433_v9 = vadd.f32 %v1381_v52, %v2245_v30 }
 0x7e9   :  { %v1383_v5 = vpop.f32.mrf.mxu0  ;;  %v1423_v0 = vpop.f32.mrf.mxu1 }
 0x7ea   :  { %1911 = vpow2.f32 %v1546_v55  ;;  %v1547_v20 = vmul.f32 -1.442695, %v1433_v9 }
 0x7eb   :  { %v1384_v39 = vpop.f32.mrf.mxu0  ;;  %v1796_v10 = vpop.f32.mrf.mxu1 }
 0x7ec   :  { %1913 = vpow2.f32 %v1547_v20 }
 0x7f7   :  { %v1912_v16 = vpop.eup %1911 }
 0x7f8   :  { %v1430_v14 = vadd.f32 1.0, %v1912_v16 }
 0x7f9   :  { %v1914_v61 = vpop.eup %1913 }
 0x7fa   :  { %1915 = vrcp.f32 %v1430_v14  ;;  %v1437_v21 = vadd.f32 1.0, %v1914_v61 }
 0x807   :  { %v1916_v29 = vpop.eup %1915 }
 0x808   :  { %v1441_v43 = vmul.f32 %v1916_v29, %v1440_v32 }
 0x80a   :  { %v1442_v63 = vadd.f32 %v1441_v43, %v2526_v22 }
 0x80c   :  { %1917 = vtanh.f32 %v1442_v63 }
 0x80d   :  { %1919 = vrcp.f32 %v1437_v21 }
 0x819   :  { %v1918_v8 = vpop.eup %1917 }
 0x81a   :  { %v1444_v51 = vsub.f32 %v1337_v42, %v1918_v8  ;;  %v1920_v18 = vpop.eup %1919 }
 0x81c   :  { %v1445_v15 = vmul.f32 %v1920_v18, %v1444_v51 }
 0x81e   :  { %v1446_v30 = vadd.f32 %v1918_v8, %v1445_v15 }
 0x820   :  { %1451 = vst [vmem:[%s2512_s5] sm:$0xff] %v1446_v30 }
 0x821   :  { %1456 = vsyncmov [#allocation6] }
 0x824   :  { %s1457_s30 = vpop.sfrf %1456 }
 0x825   :  { %p1548_p0 = scmp.ne.s32.totalorder %s1457_s30, 0 }
 0x827   :  { %1461 = shalt.err (%p1548_p0)  }
 0x828   :  { %1463 = vsyncmov [#allocation6 + $0x1] }
 0x82b   :  { %s1464_s1 = vpop.sfrf %1463 }
 0x82c   :  { %p1549_p1 = scmp.ne.s32.totalorder %s1464_s1, 0 }
 0x82e   :  { %1468 = shalt.err (%p1549_p1)  }

</bundles_post_ra>
